<compile_context>
chip_gen: v6e
topology: v6e:2x2x1
jax: 0.10.0
libtpu: 0.0.40
codegen_flags: <defaults>
</compile_context>

<pallas_src>
import functools

import jax
import jax.numpy as jnp
from jax.experimental import pallas as pl
from jax.experimental.pallas import tpu as pltpu


# ----------------------------------------------------------------------------
# Host-side helpers
# ----------------------------------------------------------------------------
def _round_up(x, m=8):
    return ((x + m - 1) // m) * m


def _hwio_to_mat(w, ci_pad, co_pad):
    """(3, 3, CI, CO) HWIO -> (co_pad, 9*ci_pad) bf16 im2col weight matrix.

    Column index is k*ci_pad + ci with k = (dh+1)*3 + (dw+1) = kh*3 + kw,
    matching the row order of the in-kernel patch matrix.  Padded rows/cols
    are zero."""
    KH, KW, CI, CO = w.shape
    wt = jnp.transpose(w, (3, 0, 1, 2))                      # (CO, KH, KW, CI)
    wt = jnp.pad(wt, ((0, co_pad - CO), (0, 0), (0, 0), (0, ci_pad - CI)))
    return wt.reshape(co_pad, KH * KW * ci_pad).astype(jnp.bfloat16)


def _bias_plane(b, co_pad, hw):
    """(CO,) bias -> lane-dense (co_pad, hw) f32 plane (padded rows zero)."""
    bp = jnp.pad(b.astype(jnp.float32), (0, co_pad - b.shape[0]))
    return jnp.broadcast_to(bp[:, None], (co_pad, hw))


# ----------------------------------------------------------------------------
# Fused Pallas kernel: one grid step == (batch element b, context shot s)
# ----------------------------------------------------------------------------
def _cross_conv_block_kernel(q_ref, c_ref, row_ref, col_ref,
                             wxq_ref, wxc_ref, bx_ref,
                             wq_ref, bq_ref, wc_ref, bc_ref,
                             oq_ref, oc_ref, zq_scr, acc_scr, *, H, W, Sy):
    f32, bf16 = jnp.float32, jnp.bfloat16
    HW = H * W
    s = pl.program_id(1)

    def patches(x):
        # x: (C, HW) f32 -> (9*C, HW) bf16 im2col patch matrix with reflect
        # padding baked in.  8 XLU lane rotations + VPU boundary selects; no
        # MXU work and no (HW, HW) gather matrices.
        row = jnp.broadcast_to(row_ref[...], x.shape)
        col = jnp.broadcast_to(col_ref[...], x.shape)
        top, bot = row == 0, row == H - 1
        lft, rgt = col == 0, col == W - 1
        up_w = pltpu.roll(x, shift=W, axis=1)          # x[h-1, w]  (wrapped)
        dn_w = pltpu.roll(x, shift=HW - W, axis=1)     # x[h+1, w]  (wrapped)
        x_up = jnp.where(top, dn_w, up_w)              # x[refl(h-1), w]
        x_dn = jnp.where(bot, up_w, dn_w)              # x[refl(h+1), w]
        taps = []
        for xv in (x_up, x, x_dn):                     # dh = -1, 0, +1
            l_w = pltpu.roll(xv, shift=1, axis=1)        # xv[h, w-1] (wrapped)
            r_w = pltpu.roll(xv, shift=HW - 1, axis=1)   # xv[h, w+1] (wrapped)
            taps.append(jnp.where(lft, r_w, l_w))      # dw = -1
            taps.append(xv)                            # dw =  0
            taps.append(jnp.where(rgt, l_w, r_w))      # dw = +1
        return jnp.concatenate(taps, axis=0).astype(bf16)

    # Query half of the cross conv + accumulator init: once per batch element.
    @pl.when(s == 0)
    def _():
        pq = patches(q_ref[0].astype(f32))
        zq_scr[...] = jnp.dot(wxq_ref[...], pq, preferred_element_type=f32)
        acc_scr[...] = jnp.zeros_like(acc_scr)

    # Cross conv for this context shot (bias/ReLU/accumulate kept in f32).
    pc = patches(c_ref[0, 0].astype(f32))
    zc = jnp.dot(wxc_ref[...], pc, preferred_element_type=f32)
    inter = jnp.maximum(zq_scr[...] + zc + bx_ref[...], 0.0)
    acc_scr[...] = acc_scr[...] + inter                # fused mean-over-support

    # Context branch conv + ReLU -> unmasked lane-dense (Co, HW) store.
    ctx = jnp.dot(wc_ref[...], patches(inter), preferred_element_type=f32)
    oc_ref[0, 0] = jnp.maximum(ctx + bc_ref[...], 0.0).astype(oc_ref.dtype)

    # Query branch: mean over support, conv, ReLU.  oq block is resident
    # across the s axis and written back to HBM once.
    @pl.when(s == Sy - 1)
    def _():
        qmean = acc_scr[...] * (1.0 / Sy)
        qn = jnp.dot(wq_ref[...], patches(qmean), preferred_element_type=f32)
        oq_ref[0, 0] = jnp.maximum(qn + bq_ref[...], 0.0).astype(oq_ref.dtype)


# ----------------------------------------------------------------------------
# Parameters (deterministic, Conv2d-style uniform init)
# ----------------------------------------------------------------------------
def init_params(key, in_channels, cross_channels, out_channels):
    concat = 2 * in_channels
    k = jax.random.split(key, 6)

    def conv_init(kw, kb, cin, cout):
        fan_in = cin * 3 * 3
        bound = 1.0 / jnp.sqrt(jnp.float32(fan_in))
        w = jax.random.uniform(kw, (3, 3, cin, cout), jnp.float32,
                               -bound, bound)
        b = jax.random.uniform(kb, (cout,), jnp.float32, -bound, bound)
        return w, b

    w_cross, b_cross = conv_init(k[0], k[1], concat, cross_channels)
    w_q, b_q = conv_init(k[2], k[3], cross_channels, out_channels)
    w_c, b_c = conv_init(k[4], k[5], cross_channels, out_channels)
    return dict(w_cross=w_cross, b_cross=b_cross,
                w_q=w_q, b_q=b_q, w_ctx=w_c, b_ctx=b_c)


# ----------------------------------------------------------------------------
# CrossConvBlock forward (single fused pallas_call)
# ----------------------------------------------------------------------------
def cross_conv_block_forward(query, context, params):
    # query: (B, Sx, Cin, H, W), context: (B, Sy, Cin, H, W)   [PyTorch layout]
    B, Sx, Cin, H, W = query.shape
    _, Sy, Cin_c, Hc, Wc = context.shape
    assert Sx == 1, "forward uses .squeeze(dim=1); implemented for Sx == 1"
    assert (Cin_c, Hc, Wc) == (Cin, H, W)
    assert H >= 2 and W >= 2          # reflect padding requirement
    HW = H * W
    Cc = params['w_cross'].shape[-1]
    Co = params['w_q'].shape[-1]
    Cin_p, Cc_p, Co_p = _round_up(Cin), _round_up(Cc), _round_up(Co)

    # NCHW already has spatial last -> flattening is metadata only; zero-pad
    # channels to a full 8-sublane tile (padded weights are zero -> exact).
    q = query.reshape(B, Cin, HW)
    c = context.reshape(B, Sy, Cin, HW)
    if Cin_p > Cin:
        q = jnp.pad(q, ((0, 0), (0, Cin_p - Cin), (0, 0)))
        c = jnp.pad(c, ((0, 0), (0, 0), (0, Cin_p - Cin), (0, 0)))

    # conv(concat(q,c), W) = conv(q, W[:, :, :Cin]) + conv(c, W[:, :, Cin:])
    wxq = _hwio_to_mat(params['w_cross'][:, :, :Cin, :], Cin_p, Cc_p)
    wxc = _hwio_to_mat(params['w_cross'][:, :, Cin:, :], Cin_p, Cc_p)
    wq = _hwio_to_mat(params['w_q'], Cc_p, Co_p)
    wc = _hwio_to_mat(params['w_ctx'], Cc_p, Co_p)
    bx = _bias_plane(params['b_cross'], Cc_p, HW)
    bq = _bias_plane(params['b_q'], Co_p, HW)
    bc = _bias_plane(params['b_ctx'], Co_p, HW)

    # Reflect-boundary index planes (avoids in-kernel vector integer div/mod).
    flat = jnp.arange(HW, dtype=jnp.int32)
    row_plane = (flat // W).reshape(1, HW)
    col_plane = (flat % W).reshape(1, HW)

    kernel = functools.partial(_cross_conv_block_kernel, H=H, W=W, Sy=Sy)

    macs = HW * (B * (Sy + 1) * Cc_p * 9 * Cin_p        # cross conv halves
                 + B * Sy * Co_p * 9 * Cc_p             # context branch
                 + B * Co_p * 9 * Cc_p)                 # query branch
    bytes_acc = (4 * (q.size + c.size + B * Co_p * HW + B * Sy * Co_p * HW
                      + bx.size + bq.size + bc.size)
                 + 2 * (wxq.size + wxc.size + wq.size + wc.size))

    out_q, out_c = pl.pallas_call(
        kernel,
        out_shape=(jax.ShapeDtypeStruct((B, 1, Co_p, HW), query.dtype),
                   jax.ShapeDtypeStruct((B, Sy, Co_p, HW), query.dtype)),
        grid=(B, Sy),
        in_specs=[
            pl.BlockSpec((1, Cin_p, HW), lambda b, s: (b, 0, 0)),        # q
            pl.BlockSpec((1, 1, Cin_p, HW), lambda b, s: (b, s, 0, 0)),  # c
            pl.BlockSpec((1, HW), lambda b, s: (0, 0)),                  # row idx
            pl.BlockSpec((1, HW), lambda b, s: (0, 0)),                  # col idx
            pl.BlockSpec((Cc_p, 9 * Cin_p), lambda b, s: (0, 0)),        # wxq
            pl.BlockSpec((Cc_p, 9 * Cin_p), lambda b, s: (0, 0)),        # wxc
            pl.BlockSpec((Cc_p, HW), lambda b, s: (0, 0)),               # bx
            pl.BlockSpec((Co_p, 9 * Cc_p), lambda b, s: (0, 0)),         # wq
            pl.BlockSpec((Co_p, HW), lambda b, s: (0, 0)),               # bq
            pl.BlockSpec((Co_p, 9 * Cc_p), lambda b, s: (0, 0)),         # wc
            pl.BlockSpec((Co_p, HW), lambda b, s: (0, 0)),               # bc
        ],
        out_specs=(
            pl.BlockSpec((1, 1, Co_p, HW), lambda b, s: (b, 0, 0, 0)),   # oq
            pl.BlockSpec((1, 1, Co_p, HW), lambda b, s: (b, s, 0, 0)),   # oc
        ),
        scratch_shapes=[pltpu.VMEM((Cc_p, HW), jnp.float32),   # zq (query half)
                        pltpu.VMEM((Cc_p, HW), jnp.float32)],  # mean accumulator
        compiler_params=pltpu.CompilerParams(
            dimension_semantics=("parallel", "arbitrary"),
            vmem_limit_bytes=32 * 1024 * 1024),
        cost_estimate=pl.CostEstimate(flops=int(2 * macs), transcendentals=0,
                                      bytes_accessed=int(bytes_acc)),
    )(q, c, row_plane, col_plane, wxq, wxc, bx, wq, bq, wc, bc)

    # metadata-only reshape back to PyTorch (B, S, C, H, W); drop channel pad
    out_q = out_q.reshape(B, 1, Co_p, H, W)[:, :, :Co]
    out_c = out_c.reshape(B, Sy, Co_p, H, W)[:, :, :Co]
    return out_q, out_c


# ----------------------------------------------------------------------------
# Pure-JAX f32 reference (for self-check)
# ----------------------------------------------------------------------------
def _ref_conv(x, w, b, relu):
    xp = jnp.pad(x, ((0, 0), (1, 1), (1, 1), (0, 0)), mode='reflect')
    y = jax.lax.conv_general_dilated(
        xp, w, (1, 1), 'VALID', dimension_numbers=('NHWC', 'HWIO', 'NHWC'))
    y = y + b
    return jnp.maximum(y, 0.0) if relu else y


def ref_forward(query, context, params):
    B, Sx, Cin, H, W = query.shape
    _, Sy, _, _, _ = context.shape
    Cc = params['w_cross'].shape[-1]
    Co = params['w_q'].shape[-1]
    q = jnp.transpose(query, (0, 1, 3, 4, 2))
    c = jnp.transpose(context, (0, 1, 3, 4, 2))
    xs = jnp.broadcast_to(q[:, :, None], (B, Sx, Sy, H, W, Cin))
    ys = jnp.broadcast_to(c[:, None, :], (B, Sx, Sy, H, W, Cin))
    xy = jnp.concatenate([xs, ys], axis=-1).reshape(B * Sx * Sy, H, W, 2 * Cin)
    inter = _ref_conv(xy, params['w_cross'], params['b_cross'], True)
    inter = inter.reshape(B, Sx, Sy, H, W, Cc)[:, 0]
    qmean = jnp.mean(inter, axis=1)
    qn = _ref_conv(qmean, params['w_q'], params['b_q'], True).reshape(
        B, 1, H, W, Co)
    cn = _ref_conv(inter.reshape(B * Sy, H, W, Cc),
                   params['w_ctx'], params['b_ctx'], True).reshape(
        B, Sy, H, W, Co)
    return (jnp.transpose(qn, (0, 1, 4, 2, 3)),
            jnp.transpose(cn, (0, 1, 4, 2, 3)))


if __name__ == "__main__":
    key = jax.random.PRNGKey(0)
    kq, kc, kp = jax.random.split(key, 3)

    B, Sx, Sy, Cin, H, W = 2, 1, 3, 4, 16, 16
    cross_channels = 8
    out_channels = cross_channels  # module default: out_channels = cross_channels

    query = jax.random.normal(kq, (B, Sx, Cin, H, W), jnp.float32)
    context = jax.random.normal(kc, (B, Sy, Cin, H, W), jnp.float32)
    params = init_params(kp, Cin, cross_channels, out_channels)

    fwd = jax.jit(cross_conv_block_forward)
    query_new, context_new = fwd(query, context, params)
    jax.block_until_ready(query_new)
    jax.block_until_ready(context_new)

    assert query_new.shape == (B, 1, out_channels, H, W)
    assert context_new.shape == (B, Sy, out_channels, H, W)

    # Self-check against a pure-f32 JAX reference.  Tolerance reflects the
    # bf16 MXU operands (accumulation is kept in f32 in the kernel).
    rq, rc = ref_forward(query, context, params)
    assert jnp.allclose(query_new, rq, atol=3e-2, rtol=2e-2), \
        float(jnp.max(jnp.abs(query_new - rq)))
    assert jnp.allclose(context_new, rc, atol=3e-2, rtol=2e-2), \
        float(jnp.max(jnp.abs(context_new - rc)))

    # TODO(synk): use_spectral=True (CrossFourierConv2d / rFFT branch) and
    # non-identity norm layers are not implemented (module defaults used).
    print("KERNEL_OK")
</pallas_src>

<mosaic_0001>
module attributes {stable_mosaic.version = 11 : i64} {
  func.func @_cross_conv_block_kernel(%arg0: i32, %arg1: i32, %arg2: memref<1x8x256xf32, #tpu.memory_space<vmem>>, %arg3: memref<1x1x8x256xf32, #tpu.memory_space<vmem>>, %arg4: memref<1x256xi32, #tpu.memory_space<vmem>>, %arg5: memref<1x256xi32, #tpu.memory_space<vmem>>, %arg6: memref<8x72xbf16, #tpu.memory_space<vmem>>, %arg7: memref<8x72xbf16, #tpu.memory_space<vmem>>, %arg8: memref<8x256xf32, #tpu.memory_space<vmem>>, %arg9: memref<8x72xbf16, #tpu.memory_space<vmem>>, %arg10: memref<8x256xf32, #tpu.memory_space<vmem>>, %arg11: memref<8x72xbf16, #tpu.memory_space<vmem>>, %arg12: memref<8x256xf32, #tpu.memory_space<vmem>>, %arg13: memref<1x1x8x256xf32, #tpu.memory_space<vmem>>, %arg14: memref<1x1x8x256xf32, #tpu.memory_space<vmem>>, %arg15: memref<8x256xf32, #tpu.memory_space<vmem>>, %arg16: memref<8x256xf32, #tpu.memory_space<vmem>>) attributes {dimension_semantics = [#tpu.dimension_semantics<parallel>, #tpu.dimension_semantics<arbitrary>], iteration_bounds = array<i64: 2, 3>, scalar_prefetch = 0 : i64, scratch_operands = 2 : i64, tpu.core_type = #tpu.core_type<tc>, window_params = [{transform_indices = @transform_0, window_bounds = array<i64: 1, 8, 256>}, {transform_indices = @transform_1, window_bounds = array<i64: 1, 1, 8, 256>}, {pipeline_mode = #tpu.pipeline_mode<synchronous>, transform_indices = @transform_2, window_bounds = array<i64: 1, 256>}, {pipeline_mode = #tpu.pipeline_mode<synchronous>, transform_indices = @transform_3, window_bounds = array<i64: 1, 256>}, {pipeline_mode = #tpu.pipeline_mode<synchronous>, transform_indices = @transform_4, window_bounds = array<i64: 8, 72>}, {pipeline_mode = #tpu.pipeline_mode<synchronous>, transform_indices = @transform_5, window_bounds = array<i64: 8, 72>}, {pipeline_mode = #tpu.pipeline_mode<synchronous>, transform_indices = @transform_6, window_bounds = array<i64: 8, 256>}, {pipeline_mode = #tpu.pipeline_mode<synchronous>, transform_indices = @transform_7, window_bounds = array<i64: 8, 72>}, {pipeline_mode = #tpu.pipeline_mode<synchronous>, transform_indices = @transform_8, window_bounds = array<i64: 8, 256>}, {pipeline_mode = #tpu.pipeline_mode<synchronous>, transform_indices = @transform_9, window_bounds = array<i64: 8, 72>}, {pipeline_mode = #tpu.pipeline_mode<synchronous>, transform_indices = @transform_10, window_bounds = array<i64: 8, 256>}, {transform_indices = @transform_11, window_bounds = array<i64: 1, 1, 8, 256>}, {transform_indices = @transform_12, window_bounds = array<i64: 1, 1, 8, 256>}]} {
    %c0_i32 = arith.constant 0 : i32
    %0 = arith.cmpi eq, %arg1, %c0_i32 : i32
    %1 = arith.extui %0 : i1 to i32
    %c0_i32_0 = arith.constant 0 : i32
    %2 = arith.cmpi ne, %1, %c0_i32_0 : i32
    scf.if %2 {
      %c0_53 = arith.constant 0 : index
      %c0_54 = arith.constant 0 : index
      %c0_55 = arith.constant 0 : index
      %92 = vector.load %arg2[%c0_53, %c0_54, %c0_55] : memref<1x8x256xf32, #tpu.memory_space<vmem>>, vector<1x8x256xf32>
      %93 = vector.shape_cast %92 : vector<1x8x256xf32> to vector<8x256xf32>
      %c0_56 = arith.constant 0 : index
      %c0_57 = arith.constant 0 : index
      %94 = vector.load %arg4[%c0_56, %c0_57] : memref<1x256xi32, #tpu.memory_space<vmem>>, vector<1x256xi32>
      %95 = vector.shape_cast %94 : vector<1x256xi32> to vector<1x256xi32>
      %96 = vector.broadcast %95 : vector<1x256xi32> to vector<8x256xi32>
      %c0_58 = arith.constant 0 : index
      %c0_59 = arith.constant 0 : index
      %97 = vector.load %arg5[%c0_58, %c0_59] : memref<1x256xi32, #tpu.memory_space<vmem>>, vector<1x256xi32>
      %98 = vector.shape_cast %97 : vector<1x256xi32> to vector<1x256xi32>
      %99 = vector.broadcast %98 : vector<1x256xi32> to vector<8x256xi32>
      %c0_i32_60 = arith.constant 0 : i32
      %100 = vector.broadcast %c0_i32_60 : i32 to vector<8x256xi32>
      %101 = arith.cmpi eq, %96, %100 : vector<8x256xi32>
      %c15_i32_61 = arith.constant 15 : i32
      %102 = vector.broadcast %c15_i32_61 : i32 to vector<8x256xi32>
      %103 = arith.cmpi eq, %96, %102 : vector<8x256xi32>
      %c0_i32_62 = arith.constant 0 : i32
      %104 = vector.broadcast %c0_i32_62 : i32 to vector<8x256xi32>
      %105 = arith.cmpi eq, %99, %104 : vector<8x256xi32>
      %c15_i32_63 = arith.constant 15 : i32
      %106 = vector.broadcast %c15_i32_63 : i32 to vector<8x256xi32>
      %107 = arith.cmpi eq, %99, %106 : vector<8x256xi32>
      %c16_i32_64 = arith.constant 16 : i32
      %108 = tpu.dynamic_rotate %93 by %c16_i32_64 dim 1 : vector<8x256xf32>, i32 -> vector<8x256xf32>
      %c240_i32_65 = arith.constant 240 : i32
      %109 = tpu.dynamic_rotate %93 by %c240_i32_65 dim 1 : vector<8x256xf32>, i32 -> vector<8x256xf32>
      %110 = arith.select %101, %109, %108 : vector<8x256xi1>, vector<8x256xf32>
      %111 = arith.select %103, %108, %109 : vector<8x256xi1>, vector<8x256xf32>
      %c1_i32_66 = arith.constant 1 : i32
      %112 = tpu.dynamic_rotate %110 by %c1_i32_66 dim 1 : vector<8x256xf32>, i32 -> vector<8x256xf32>
      %c255_i32_67 = arith.constant 255 : i32
      %113 = tpu.dynamic_rotate %110 by %c255_i32_67 dim 1 : vector<8x256xf32>, i32 -> vector<8x256xf32>
      %114 = arith.select %105, %113, %112 : vector<8x256xi1>, vector<8x256xf32>
      %115 = arith.select %107, %112, %113 : vector<8x256xi1>, vector<8x256xf32>
      %c1_i32_68 = arith.constant 1 : i32
      %116 = tpu.dynamic_rotate %93 by %c1_i32_68 dim 1 : vector<8x256xf32>, i32 -> vector<8x256xf32>
      %c255_i32_69 = arith.constant 255 : i32
      %117 = tpu.dynamic_rotate %93 by %c255_i32_69 dim 1 : vector<8x256xf32>, i32 -> vector<8x256xf32>
      %118 = arith.select %105, %117, %116 : vector<8x256xi1>, vector<8x256xf32>
      %119 = arith.select %107, %116, %117 : vector<8x256xi1>, vector<8x256xf32>
      %c1_i32_70 = arith.constant 1 : i32
      %120 = tpu.dynamic_rotate %111 by %c1_i32_70 dim 1 : vector<8x256xf32>, i32 -> vector<8x256xf32>
      %c255_i32_71 = arith.constant 255 : i32
      %121 = tpu.dynamic_rotate %111 by %c255_i32_71 dim 1 : vector<8x256xf32>, i32 -> vector<8x256xf32>
      %122 = arith.select %105, %121, %120 : vector<8x256xi1>, vector<8x256xf32>
      %123 = arith.select %107, %120, %121 : vector<8x256xi1>, vector<8x256xf32>
      %124 = tpu.concatenate %114, %110, %115, %118, %93, %119, %122, %111, %123 in 0 : vector<8x256xf32>, vector<8x256xf32>, vector<8x256xf32>, vector<8x256xf32>, vector<8x256xf32>, vector<8x256xf32>, vector<8x256xf32>, vector<8x256xf32>, vector<8x256xf32> -> vector<72x256xf32>
      %125 = arith.truncf %124 : vector<72x256xf32> to vector<72x256xbf16>
      %c0_72 = arith.constant 0 : index
      %c0_73 = arith.constant 0 : index
      %126 = vector.load %arg6[%c0_72, %c0_73] : memref<8x72xbf16, #tpu.memory_space<vmem>>, vector<8x72xbf16>
      %cst_74 = arith.constant dense<0.000000e+00> : vector<8x256xf32>
      %127 = tpu.matmul %126, %125, %cst_74 {dimension_numbers = #tpu.dot_dimension_numbers<[1], [0], [0], [1], [0, 0, 1, 1], [], []>} : vector<8x72xbf16>, vector<72x256xbf16>, vector<8x256xf32> -> vector<8x256xf32>
      %c0_75 = arith.constant 0 : index
      %c0_76 = arith.constant 0 : index
      %128 = vector.load %arg15[%c0_75, %c0_76] : memref<8x256xf32, #tpu.memory_space<vmem>>, vector<8x256xf32>
      tpu.vector_store %arg15[%c0_75, %c0_76], %127 {strides = array<i32>} : memref<8x256xf32, #tpu.memory_space<vmem>>, vector<8x256xf32>,
      %cst_77 = arith.constant 0.000000e+00 : f32
      %129 = vector.broadcast %cst_77 : f32 to vector<8x256xf32>
      %c0_78 = arith.constant 0 : index
      %c0_79 = arith.constant 0 : index
      %130 = vector.load %arg16[%c0_78, %c0_79] : memref<8x256xf32, #tpu.memory_space<vmem>>, vector<8x256xf32>
      tpu.vector_store %arg16[%c0_78, %c0_79], %129 {strides = array<i32>} : memref<8x256xf32, #tpu.memory_space<vmem>>, vector<8x256xf32>,
    } else {
    }
    %c0 = arith.constant 0 : index
    %c0_1 = arith.constant 0 : index
    %c0_2 = arith.constant 0 : index
    %c0_3 = arith.constant 0 : index
    %3 = vector.load %arg3[%c0, %c0_1, %c0_2, %c0_3] : memref<1x1x8x256xf32, #tpu.memory_space<vmem>>, vector<1x1x8x256xf32>
    %4 = vector.shape_cast %3 : vector<1x1x8x256xf32> to vector<8x256xf32>
    %c0_4 = arith.constant 0 : index
    %c0_5 = arith.constant 0 : index
    %5 = vector.load %arg4[%c0_4, %c0_5] : memref<1x256xi32, #tpu.memory_space<vmem>>, vector<1x256xi32>
    %6 = vector.shape_cast %5 : vector<1x256xi32> to vector<1x256xi32>
    %7 = vector.broadcast %6 : vector<1x256xi32> to vector<8x256xi32>
    %c0_6 = arith.constant 0 : index
    %c0_7 = arith.constant 0 : index
    %8 = vector.load %arg5[%c0_6, %c0_7] : memref<1x256xi32, #tpu.memory_space<vmem>>, vector<1x256xi32>
    %9 = vector.shape_cast %8 : vector<1x256xi32> to vector<1x256xi32>
    %10 = vector.broadcast %9 : vector<1x256xi32> to vector<8x256xi32>
    %c0_i32_8 = arith.constant 0 : i32
    %11 = vector.broadcast %c0_i32_8 : i32 to vector<8x256xi32>
    %12 = arith.cmpi eq, %7, %11 : vector<8x256xi32>
    %c15_i32 = arith.constant 15 : i32
    %13 = vector.broadcast %c15_i32 : i32 to vector<8x256xi32>
    %14 = arith.cmpi eq, %7, %13 : vector<8x256xi32>
    %c0_i32_9 = arith.constant 0 : i32
    %15 = vector.broadcast %c0_i32_9 : i32 to vector<8x256xi32>
    %16 = arith.cmpi eq, %10, %15 : vector<8x256xi32>
    %c15_i32_10 = arith.constant 15 : i32
    %17 = vector.broadcast %c15_i32_10 : i32 to vector<8x256xi32>
    %18 = arith.cmpi eq, %10, %17 : vector<8x256xi32>
    %c16_i32 = arith.constant 16 : i32
    %19 = tpu.dynamic_rotate %4 by %c16_i32 dim 1 : vector<8x256xf32>, i32 -> vector<8x256xf32>
    %c240_i32 = arith.constant 240 : i32
    %20 = tpu.dynamic_rotate %4 by %c240_i32 dim 1 : vector<8x256xf32>, i32 -> vector<8x256xf32>
    %21 = arith.select %12, %20, %19 : vector<8x256xi1>, vector<8x256xf32>
    %22 = arith.select %14, %19, %20 : vector<8x256xi1>, vector<8x256xf32>
    %c1_i32 = arith.constant 1 : i32
    %23 = tpu.dynamic_rotate %21 by %c1_i32 dim 1 : vector<8x256xf32>, i32 -> vector<8x256xf32>
    %c255_i32 = arith.constant 255 : i32
    %24 = tpu.dynamic_rotate %21 by %c255_i32 dim 1 : vector<8x256xf32>, i32 -> vector<8x256xf32>
    %25 = arith.select %16, %24, %23 : vector<8x256xi1>, vector<8x256xf32>
    %26 = arith.select %18, %23, %24 : vector<8x256xi1>, vector<8x256xf32>
    %c1_i32_11 = arith.constant 1 : i32
    %27 = tpu.dynamic_rotate %4 by %c1_i32_11 dim 1 : vector<8x256xf32>, i32 -> vector<8x256xf32>
    %c255_i32_12 = arith.constant 255 : i32
    %28 = tpu.dynamic_rotate %4 by %c255_i32_12 dim 1 : vector<8x256xf32>, i32 -> vector<8x256xf32>
    %29 = arith.select %16, %28, %27 : vector<8x256xi1>, vector<8x256xf32>
    %30 = arith.select %18, %27, %28 : vector<8x256xi1>, vector<8x256xf32>
    %c1_i32_13 = arith.constant 1 : i32
    %31 = tpu.dynamic_rotate %22 by %c1_i32_13 dim 1 : vector<8x256xf32>, i32 -> vector<8x256xf32>
    %c255_i32_14 = arith.constant 255 : i32
    %32 = tpu.dynamic_rotate %22 by %c255_i32_14 dim 1 : vector<8x256xf32>, i32 -> vector<8x256xf32>
    %33 = arith.select %16, %32, %31 : vector<8x256xi1>, vector<8x256xf32>
    %34 = arith.select %18, %31, %32 : vector<8x256xi1>, vector<8x256xf32>
    %35 = tpu.concatenate %25, %21, %26, %29, %4, %30, %33, %22, %34 in 0 : vector<8x256xf32>, vector<8x256xf32>, vector<8x256xf32>, vector<8x256xf32>, vector<8x256xf32>, vector<8x256xf32>, vector<8x256xf32>, vector<8x256xf32>, vector<8x256xf32> -> vector<72x256xf32>
    %36 = arith.truncf %35 : vector<72x256xf32> to vector<72x256xbf16>
    %c0_15 = arith.constant 0 : index
    %c0_16 = arith.constant 0 : index
    %37 = vector.load %arg7[%c0_15, %c0_16] : memref<8x72xbf16, #tpu.memory_space<vmem>>, vector<8x72xbf16>
    %cst = arith.constant dense<0.000000e+00> : vector<8x256xf32>
    %38 = tpu.matmul %37, %36, %cst {dimension_numbers = #tpu.dot_dimension_numbers<[1], [0], [0], [1], [0, 0, 1, 1], [], []>} : vector<8x72xbf16>, vector<72x256xbf16>, vector<8x256xf32> -> vector<8x256xf32>
    %c0_17 = arith.constant 0 : index
    %c0_18 = arith.constant 0 : index
    %39 = vector.load %arg15[%c0_17, %c0_18] : memref<8x256xf32, #tpu.memory_space<vmem>>, vector<8x256xf32>
    %40 = arith.addf %39, %38 : vector<8x256xf32>
    %c0_19 = arith.constant 0 : index
    %c0_20 = arith.constant 0 : index
    %41 = vector.load %arg8[%c0_19, %c0_20] : memref<8x256xf32, #tpu.memory_space<vmem>>, vector<8x256xf32>
    %42 = arith.addf %40, %41 : vector<8x256xf32>
    %cst_21 = arith.constant 0.000000e+00 : f32
    %43 = vector.broadcast %cst_21 : f32 to vector<8x256xf32>
    %44 = arith.maximumf %42, %43 : vector<8x256xf32>
    %c0_22 = arith.constant 0 : index
    %c0_23 = arith.constant 0 : index
    %45 = vector.load %arg16[%c0_22, %c0_23] : memref<8x256xf32, #tpu.memory_space<vmem>>, vector<8x256xf32>
    %46 = arith.addf %45, %44 : vector<8x256xf32>
    %c0_24 = arith.constant 0 : index
    %c0_25 = arith.constant 0 : index
    %47 = vector.load %arg16[%c0_24, %c0_25] : memref<8x256xf32, #tpu.memory_space<vmem>>, vector<8x256xf32>
    tpu.vector_store %arg16[%c0_24, %c0_25], %46 {strides = array<i32>} : memref<8x256xf32, #tpu.memory_space<vmem>>, vector<8x256xf32>,
    %c0_26 = arith.constant 0 : index
    %c0_27 = arith.constant 0 : index
    %48 = vector.load %arg11[%c0_26, %c0_27] : memref<8x72xbf16, #tpu.memory_space<vmem>>, vector<8x72xbf16>
    %c0_28 = arith.constant 0 : index
    %c0_29 = arith.constant 0 : index
    %49 = vector.load %arg4[%c0_28, %c0_29] : memref<1x256xi32, #tpu.memory_space<vmem>>, vector<1x256xi32>
    %50 = vector.shape_cast %49 : vector<1x256xi32> to vector<1x256xi32>
    %51 = vector.broadcast %50 : vector<1x256xi32> to vector<8x256xi32>
    %c0_30 = arith.constant 0 : index
    %c0_31 = arith.constant 0 : index
    %52 = vector.load %arg5[%c0_30, %c0_31] : memref<1x256xi32, #tpu.memory_space<vmem>>, vector<1x256xi32>
    %53 = vector.shape_cast %52 : vector<1x256xi32> to vector<1x256xi32>
    %54 = vector.broadcast %53 : vector<1x256xi32> to vector<8x256xi32>
    %c0_i32_32 = arith.constant 0 : i32
    %55 = vector.broadcast %c0_i32_32 : i32 to vector<8x256xi32>
    %56 = arith.cmpi eq, %51, %55 : vector<8x256xi32>
    %c15_i32_33 = arith.constant 15 : i32
    %57 = vector.broadcast %c15_i32_33 : i32 to vector<8x256xi32>
    %58 = arith.cmpi eq, %51, %57 : vector<8x256xi32>
    %c0_i32_34 = arith.constant 0 : i32
    %59 = vector.broadcast %c0_i32_34 : i32 to vector<8x256xi32>
    %60 = arith.cmpi eq, %54, %59 : vector<8x256xi32>
    %c15_i32_35 = arith.constant 15 : i32
    %61 = vector.broadcast %c15_i32_35 : i32 to vector<8x256xi32>
    %62 = arith.cmpi eq, %54, %61 : vector<8x256xi32>
    %c16_i32_36 = arith.constant 16 : i32
    %63 = tpu.dynamic_rotate %44 by %c16_i32_36 dim 1 : vector<8x256xf32>, i32 -> vector<8x256xf32>
    %c240_i32_37 = arith.constant 240 : i32
    %64 = tpu.dynamic_rotate %44 by %c240_i32_37 dim 1 : vector<8x256xf32>, i32 -> vector<8x256xf32>
    %65 = arith.select %56, %64, %63 : vector<8x256xi1>, vector<8x256xf32>
    %66 = arith.select %58, %63, %64 : vector<8x256xi1>, vector<8x256xf32>
    %c1_i32_38 = arith.constant 1 : i32
    %67 = tpu.dynamic_rotate %65 by %c1_i32_38 dim 1 : vector<8x256xf32>, i32 -> vector<8x256xf32>
    %c255_i32_39 = arith.constant 255 : i32
    %68 = tpu.dynamic_rotate %65 by %c255_i32_39 dim 1 : vector<8x256xf32>, i32 -> vector<8x256xf32>
    %69 = arith.select %60, %68, %67 : vector<8x256xi1>, vector<8x256xf32>
    %70 = arith.select %62, %67, %68 : vector<8x256xi1>, vector<8x256xf32>
    %c1_i32_40 = arith.constant 1 : i32
    %71 = tpu.dynamic_rotate %44 by %c1_i32_40 dim 1 : vector<8x256xf32>, i32 -> vector<8x256xf32>
    %c255_i32_41 = arith.constant 255 : i32
    %72 = tpu.dynamic_rotate %44 by %c255_i32_41 dim 1 : vector<8x256xf32>, i32 -> vector<8x256xf32>
    %73 = arith.select %60, %72, %71 : vector<8x256xi1>, vector<8x256xf32>
    %74 = arith.select %62, %71, %72 : vector<8x256xi1>, vector<8x256xf32>
    %c1_i32_42 = arith.constant 1 : i32
    %75 = tpu.dynamic_rotate %66 by %c1_i32_42 dim 1 : vector<8x256xf32>, i32 -> vector<8x256xf32>
    %c255_i32_43 = arith.constant 255 : i32
    %76 = tpu.dynamic_rotate %66 by %c255_i32_43 dim 1 : vector<8x256xf32>, i32 -> vector<8x256xf32>
    %77 = arith.select %60, %76, %75 : vector<8x256xi1>, vector<8x256xf32>
    %78 = arith.select %62, %75, %76 : vector<8x256xi1>, vector<8x256xf32>
    %79 = tpu.concatenate %69, %65, %70, %73, %44, %74, %77, %66, %78 in 0 : vector<8x256xf32>, vector<8x256xf32>, vector<8x256xf32>, vector<8x256xf32>, vector<8x256xf32>, vector<8x256xf32>, vector<8x256xf32>, vector<8x256xf32>, vector<8x256xf32> -> vector<72x256xf32>
    %80 = arith.truncf %79 : vector<72x256xf32> to vector<72x256xbf16>
    %cst_44 = arith.constant dense<0.000000e+00> : vector<8x256xf32>
    %81 = tpu.matmul %48, %80, %cst_44 {dimension_numbers = #tpu.dot_dimension_numbers<[1], [0], [0], [1], [0, 0, 1, 1], [], []>} : vector<8x72xbf16>, vector<72x256xbf16>, vector<8x256xf32> -> vector<8x256xf32>
    %c0_45 = arith.constant 0 : index
    %c0_46 = arith.constant 0 : index
    %82 = vector.load %arg12[%c0_45, %c0_46] : memref<8x256xf32, #tpu.memory_space<vmem>>, vector<8x256xf32>
    %83 = arith.addf %81, %82 : vector<8x256xf32>
    %cst_47 = arith.constant 0.000000e+00 : f32
    %84 = vector.broadcast %cst_47 : f32 to vector<8x256xf32>
    %85 = arith.maximumf %83, %84 : vector<8x256xf32>
    %c0_48 = arith.constant 0 : index
    %c0_49 = arith.constant 0 : index
    %c0_50 = arith.constant 0 : index
    %c0_51 = arith.constant 0 : index
    %86 = vector.load %arg14[%c0_48, %c0_49, %c0_50, %c0_51] : memref<1x1x8x256xf32, #tpu.memory_space<vmem>>, vector<1x1x8x256xf32>
    %87 = vector.shape_cast %86 : vector<1x1x8x256xf32> to vector<8x256xf32>
    %88 = vector.shape_cast %85 : vector<8x256xf32> to vector<1x1x8x256xf32>
    tpu.vector_store %arg14[%c0_48, %c0_49, %c0_50, %c0_51], %88 {strides = array<i32>} : memref<1x1x8x256xf32, #tpu.memory_space<vmem>>, vector<1x1x8x256xf32>,
    %c2_i32 = arith.constant 2 : i32
    %89 = arith.cmpi eq, %arg1, %c2_i32 : i32
    %90 = arith.extui %89 : i1 to i32
    %c0_i32_52 = arith.constant 0 : i32
    %91 = arith.cmpi ne, %90, %c0_i32_52 : i32
    scf.if %91 {
      %c0_53 = arith.constant 0 : index
      %c0_54 = arith.constant 0 : index
      %92 = vector.load %arg16[%c0_53, %c0_54] : memref<8x256xf32, #tpu.memory_space<vmem>>, vector<8x256xf32>
      %cst_55 = arith.constant 0.333333343 : f32
      %93 = vector.broadcast %cst_55 : f32 to vector<8x256xf32>
      %94 = arith.mulf %92, %93 : vector<8x256xf32>
      %c0_56 = arith.constant 0 : index
      %c0_57 = arith.constant 0 : index
      %95 = vector.load %arg9[%c0_56, %c0_57] : memref<8x72xbf16, #tpu.memory_space<vmem>>, vector<8x72xbf16>
      %c0_58 = arith.constant 0 : index
      %c0_59 = arith.constant 0 : index
      %96 = vector.load %arg4[%c0_58, %c0_59] : memref<1x256xi32, #tpu.memory_space<vmem>>, vector<1x256xi32>
      %97 = vector.shape_cast %96 : vector<1x256xi32> to vector<1x256xi32>
      %98 = vector.broadcast %97 : vector<1x256xi32> to vector<8x256xi32>
      %c0_60 = arith.constant 0 : index
      %c0_61 = arith.constant 0 : index
      %99 = vector.load %arg5[%c0_60, %c0_61] : memref<1x256xi32, #tpu.memory_space<vmem>>, vector<1x256xi32>
      %100 = vector.shape_cast %99 : vector<1x256xi32> to vector<1x256xi32>
      %101 = vector.broadcast %100 : vector<1x256xi32> to vector<8x256xi32>
      %c0_i32_62 = arith.constant 0 : i32
      %102 = vector.broadcast %c0_i32_62 : i32 to vector<8x256xi32>
      %103 = arith.cmpi eq, %98, %102 : vector<8x256xi32>
      %c15_i32_63 = arith.constant 15 : i32
      %104 = vector.broadcast %c15_i32_63 : i32 to vector<8x256xi32>
      %105 = arith.cmpi eq, %98, %104 : vector<8x256xi32>
      %c0_i32_64 = arith.constant 0 : i32
      %106 = vector.broadcast %c0_i32_64 : i32 to vector<8x256xi32>
      %107 = arith.cmpi eq, %101, %106 : vector<8x256xi32>
      %c15_i32_65 = arith.constant 15 : i32
      %108 = vector.broadcast %c15_i32_65 : i32 to vector<8x256xi32>
      %109 = arith.cmpi eq, %101, %108 : vector<8x256xi32>
      %c16_i32_66 = arith.constant 16 : i32
      %110 = tpu.dynamic_rotate %94 by %c16_i32_66 dim 1 : vector<8x256xf32>, i32 -> vector<8x256xf32>
      %c240_i32_67 = arith.constant 240 : i32
      %111 = tpu.dynamic_rotate %94 by %c240_i32_67 dim 1 : vector<8x256xf32>, i32 -> vector<8x256xf32>
      %112 = arith.select %103, %111, %110 : vector<8x256xi1>, vector<8x256xf32>
      %113 = arith.select %105, %110, %111 : vector<8x256xi1>, vector<8x256xf32>
      %c1_i32_68 = arith.constant 1 : i32
      %114 = tpu.dynamic_rotate %112 by %c1_i32_68 dim 1 : vector<8x256xf32>, i32 -> vector<8x256xf32>
      %c255_i32_69 = arith.constant 255 : i32
      %115 = tpu.dynamic_rotate %112 by %c255_i32_69 dim 1 : vector<8x256xf32>, i32 -> vector<8x256xf32>
      %116 = arith.select %107, %115, %114 : vector<8x256xi1>, vector<8x256xf32>
      %117 = arith.select %109, %114, %115 : vector<8x256xi1>, vector<8x256xf32>
      %c1_i32_70 = arith.constant 1 : i32
      %118 = tpu.dynamic_rotate %94 by %c1_i32_70 dim 1 : vector<8x256xf32>, i32 -> vector<8x256xf32>
      %c255_i32_71 = arith.constant 255 : i32
      %119 = tpu.dynamic_rotate %94 by %c255_i32_71 dim 1 : vector<8x256xf32>, i32 -> vector<8x256xf32>
      %120 = arith.select %107, %119, %118 : vector<8x256xi1>, vector<8x256xf32>
      %121 = arith.select %109, %118, %119 : vector<8x256xi1>, vector<8x256xf32>
      %c1_i32_72 = arith.constant 1 : i32
      %122 = tpu.dynamic_rotate %113 by %c1_i32_72 dim 1 : vector<8x256xf32>, i32 -> vector<8x256xf32>
      %c255_i32_73 = arith.constant 255 : i32
      %123 = tpu.dynamic_rotate %113 by %c255_i32_73 dim 1 : vector<8x256xf32>, i32 -> vector<8x256xf32>
      %124 = arith.select %107, %123, %122 : vector<8x256xi1>, vector<8x256xf32>
      %125 = arith.select %109, %122, %123 : vector<8x256xi1>, vector<8x256xf32>
      %126 = tpu.concatenate %116, %112, %117, %120, %94, %121, %124, %113, %125 in 0 : vector<8x256xf32>, vector<8x256xf32>, vector<8x256xf32>, vector<8x256xf32>, vector<8x256xf32>, vector<8x256xf32>, vector<8x256xf32>, vector<8x256xf32>, vector<8x256xf32> -> vector<72x256xf32>
      %127 = arith.truncf %126 : vector<72x256xf32> to vector<72x256xbf16>
      %cst_74 = arith.constant dense<0.000000e+00> : vector<8x256xf32>
      %128 = tpu.matmul %95, %127, %cst_74 {dimension_numbers = #tpu.dot_dimension_numbers<[1], [0], [0], [1], [0, 0, 1, 1], [], []>} : vector<8x72xbf16>, vector<72x256xbf16>, vector<8x256xf32> -> vector<8x256xf32>
      %c0_75 = arith.constant 0 : index
      %c0_76 = arith.constant 0 : index
      %129 = vector.load %arg10[%c0_75, %c0_76] : memref<8x256xf32, #tpu.memory_space<vmem>>, vector<8x256xf32>
      %130 = arith.addf %128, %129 : vector<8x256xf32>
      %cst_77 = arith.constant 0.000000e+00 : f32
      %131 = vector.broadcast %cst_77 : f32 to vector<8x256xf32>
      %132 = arith.maximumf %130, %131 : vector<8x256xf32>
      %c0_78 = arith.constant 0 : index
      %c0_79 = arith.constant 0 : index
      %c0_80 = arith.constant 0 : index
      %c0_81 = arith.constant 0 : index
      %133 = vector.load %arg13[%c0_78, %c0_79, %c0_80, %c0_81] : memref<1x1x8x256xf32, #tpu.memory_space<vmem>>, vector<1x1x8x256xf32>
      %134 = vector.shape_cast %133 : vector<1x1x8x256xf32> to vector<8x256xf32>
      %135 = vector.shape_cast %132 : vector<8x256xf32> to vector<1x1x8x256xf32>
      tpu.vector_store %arg13[%c0_78, %c0_79, %c0_80, %c0_81], %135 {strides = array<i32>} : memref<1x1x8x256xf32, #tpu.memory_space<vmem>>, vector<1x1x8x256xf32>,
    } else {
    }
    return
  }
  func.func @transform_0(%arg0: i32, %arg1: i32) -> (i32, i32, i32) {
    %c0_i32 = arith.constant 0 : i32
    %c0_i32_0 = arith.constant 0 : i32
    %c0_i32_1 = arith.constant 0 : i32
    return %arg0, %c0_i32, %c0_i32_0 : i32, i32, i32
  }
  func.func @transform_1(%arg0: i32, %arg1: i32) -> (i32, i32, i32, i32) {
    %c0_i32 = arith.constant 0 : i32
    %c0_i32_0 = arith.constant 0 : i32
    %c0_i32_1 = arith.constant 0 : i32
    return %arg0, %arg1, %c0_i32, %c0_i32_0 : i32, i32, i32, i32
  }
  func.func @transform_2(%arg0: i32, %arg1: i32) -> (i32, i32) {
    %c0_i32 = arith.constant 0 : i32
    %c0_i32_0 = arith.constant 0 : i32
    %c0_i32_1 = arith.constant 0 : i32
    return %c0_i32, %c0_i32_0 : i32, i32
  }
  func.func @transform_3(%arg0: i32, %arg1: i32) -> (i32, i32) {
    %c0_i32 = arith.constant 0 : i32
    %c0_i32_0 = arith.constant 0 : i32
    %c0_i32_1 = arith.constant 0 : i32
    return %c0_i32, %c0_i32_0 : i32, i32
  }
  func.func @transform_4(%arg0: i32, %arg1: i32) -> (i32, i32) {
    %c0_i32 = arith.constant 0 : i32
    %c0_i32_0 = arith.constant 0 : i32
    %c0_i32_1 = arith.constant 0 : i32
    return %c0_i32, %c0_i32_0 : i32, i32
  }
  func.func @transform_5(%arg0: i32, %arg1: i32) -> (i32, i32) {
    %c0_i32 = arith.constant 0 : i32
    %c0_i32_0 = arith.constant 0 : i32
    %c0_i32_1 = arith.constant 0 : i32
    return %c0_i32, %c0_i32_0 : i32, i32
  }
  func.func @transform_6(%arg0: i32, %arg1: i32) -> (i32, i32) {
    %c0_i32 = arith.constant 0 : i32
    %c0_i32_0 = arith.constant 0 : i32
    %c0_i32_1 = arith.constant 0 : i32
    return %c0_i32, %c0_i32_0 : i32, i32
  }
  func.func @transform_7(%arg0: i32, %arg1: i32) -> (i32, i32) {
    %c0_i32 = arith.constant 0 : i32
    %c0_i32_0 = arith.constant 0 : i32
    %c0_i32_1 = arith.constant 0 : i32
    return %c0_i32, %c0_i32_0 : i32, i32
  }
  func.func @transform_8(%arg0: i32, %arg1: i32) -> (i32, i32) {
    %c0_i32 = arith.constant 0 : i32
    %c0_i32_0 = arith.constant 0 : i32
    %c0_i32_1 = arith.constant 0 : i32
    return %c0_i32, %c0_i32_0 : i32, i32
  }
  func.func @transform_9(%arg0: i32, %arg1: i32) -> (i32, i32) {
    %c0_i32 = arith.constant 0 : i32
    %c0_i32_0 = arith.constant 0 : i32
    %c0_i32_1 = arith.constant 0 : i32
    return %c0_i32, %c0_i32_0 : i32, i32
  }
  func.func @transform_10(%arg0: i32, %arg1: i32) -> (i32, i32) {
    %c0_i32 = arith.constant 0 : i32
    %c0_i32_0 = arith.constant 0 : i32
    %c0_i32_1 = arith.constant 0 : i32
    return %c0_i32, %c0_i32_0 : i32, i32
  }
  func.func @transform_11(%arg0: i32, %arg1: i32) -> (i32, i32, i32, i32) {
    %c0_i32 = arith.constant 0 : i32
    %c0_i32_0 = arith.constant 0 : i32
    %c0_i32_1 = arith.constant 0 : i32
    %c0_i32_2 = arith.constant 0 : i32
    return %arg0, %c0_i32, %c0_i32_0, %c0_i32_1 : i32, i32, i32, i32
  }
  func.func @transform_12(%arg0: i32, %arg1: i32) -> (i32, i32, i32, i32) {
    %c0_i32 = arith.constant 0 : i32
    %c0_i32_0 = arith.constant 0 : i32
    %c0_i32_1 = arith.constant 0 : i32
    return %arg0, %arg1, %c0_i32, %c0_i32_0 : i32, i32, i32, i32
  }
}

</mosaic_0001>

<bundles_post_ra>
// kernel: cross_conv_block_forward.1
= control target key start
LH: loop header
LB: loop body
LE: loop exit
PB: predicated region body
PF: predicated region fallthrough
CT: control target
= control target key end

     0   :  { %s1657_s21 = smov 0   ;;  %s1659_s22 = smov 0   ;;  %s2144_s0 = inlined_call_operand.vmem [shape: f32[2,8,256], index: 0, kind: input, shape index: {}]   ;;  %s2145_s1 = inlined_call_operand.vmem [shape: f32[2,3,8,256], index: 1, kind: input, shape index: {}]   ;;  %s2146_s2 = inlined_call_operand.vmem [shape: s32[1,256], index: 2, kind: input, shape index: {}]   ;;  %s2147_s3 = inlined_call_operand.vmem [shape: s32[1,256], index: 3, kind: input, shape index: {}]   ;;  %s2148_s4 = inlined_call_operand.vmem [shape: bf16[8,72], index: 4, kind: input, shape index: {}]   ;;  %s2149_s5 = inlined_call_operand.vmem [shape: bf16[8,72], index: 5, kind: input, shape index: {}]   ;;  %s2150_s6 = inlined_call_operand.vmem [shape: f32[8,256], index: 6, kind: input, shape index: {}]   ;;  %s2151_s7 = inlined_call_operand.vmem [shape: bf16[8,72], index: 7, kind: input, shape index: {}]   ;;  %s2152_s8 = inlined_call_operand.vmem [shape: f32[8,256], index: 8, kind: input, shape index: {}]   ;;  %s2153_s9 = inlined_call_operand.vmem [shape: bf16[8,72], index: 9, kind: input, shape index: {}]   ;;  %s2154_s10 = inlined_call_operand.vmem [shape: f32[8,256], index: 10, kind: input, shape index: {}]   ;;  %s2155_s11 = inlined_call_operand.vmem [shape: f32[2,1,8,256], index: 11, kind: output, shape index: {0}]   ;;  %s2156_s12 = inlined_call_operand.vmem [shape: f32[2,3,8,256], index: 12, kind: output, shape index: {1}]  }
   0x1   :  { %2161 = sst [smem:[#allocation9_spill]] %s2152_s8  ;;  %s1661_s23 = smov 0  }
   0x2   :  { %s1663_s24 = smov 0   ;;  %s1665_s25 = smov 0  }
   0x3 LB: > { %2162 = sst [smem:[#allocation4_spill]] %s1566_s23  ;;  %s32_s26 = sadd.s32 1, %s1566_s23  ;;  %s1574_s25 = sphi %s1665_s25, %s23_s25   ;;  %s1570_s24 = sphi %s1663_s24, %s2172_s24   ;;  %s1566_s23 = sphi %s1661_s23, %s2171_s23   ;;  %s1562_s22 = sphi %s1659_s22, %s2170_s22   ;;  %s1558_s21 = sphi %s1657_s21, %s2169_s21  }
   0x4   : > { %2163 = sst [smem:[#allocation5_spill]] %s1570_s24  ;;  %s35_s27 = sadd.s32 1, %s1570_s24 }
   0x5   : > { %2164 = sst [smem:[#allocation6_spill]] %s1574_s25  ;;  %p33_p0 = scmp.ge.s32.totalorder %s32_s26, 3 }
   0x6   : > { %p1296_p1 = scmp.ge.s32.totalorder %s1574_s25, 1  ;;  %p395_p2 = scmp.lt.s32.totalorder %s1574_s25, 7 }
   0x7   : > { %s2174_s26 = smov (%p33_p0, %s32_s26), 0  ;;  %s2176_s27 = smov (!%p33_p0, %s35_s27), %s1570_s24 }
   0x8   : > { %2165 = sst [smem:[#allocation7_spill]] %s2174_s26  ;;  %p396_p3 = pnand %p1296_p1, %p395_p2 }
   0x9   : > { %p37_p4 = scmp.ge.s32.totalorder %s2176_s27, 2  ;;  %p455_p5 = scmp.lt.s32.totalorder (!%p396_p3), %s1562_s22, 1 }
   0xa   : > { %399 = sbr.rel (%p396_p3) target bundleno = 1911 (0x777), region = 64  ;;  %p462_p6 = scmp.lt.s32.totalorder (!%p396_p3), %s1558_s21, 2 }
   0xb   : > { %s2178_s27 = smov (%p37_p4, %s2176_s27), 0  ;;  %p1305_p7 = scmp.ne.s32.totalorder (!%p396_p3), %s1558_s21, 0 }
   0xc   : > { %2166 = sst [smem:[#allocation8_spill]] %s2178_s27 }
   0xf   : > { %s2180_s22 = smov (!%p455_p5, %s1562_s22), 1  ;;  %s1577_s24 = smov (!%p1305_p7), 112  }
  0x10   : > { %s463_s28 = scalar_select %p462_p6, %s1558_s21, 2 }
  0x11   : > { %s1317_s29 = sshll.u32 %s2180_s22, 4  ;;  %s1319_s30 = smul.u32 6, %s2180_s22 }
  0x12   : > { %s459_s15 = scalar_lea.vmem %s2144_s0, %s1317_s29  ;;  %s1299_s16 = sshll.u32 %s463_s28, 1 }
  0x13   : > { %s466_s17 = sadd.s32 %s1319_s30, %s1299_s16  ;;  %s1697_s20 = scalar_lea.vmem %s2155_s11, %s1317_s29 }
  0x14   : > { %s1300_s27 = sshll.u32 %s466_s17, 3  ;;  %487 = sbr.rel (%p1305_p7) target bundleno = 497 (0x1f1), region = 68 }
  0x15   : > { %s1702_s23 = scalar_lea.vmem %s2145_s1, %s1300_s27  ;;  %s1707_s22 = scalar_lea.vmem %s2156_s12, %s1300_s27 }
  0x16   : > { %s1576_s28 = smov (!%p1305_p7), 16   ;;  %s1578_s26 = smov (!%p1305_p7), 1  }
  0x17   : > { %s1579_s27 = smov (!%p1305_p7), 127  }
  0x19   : > { %v1710_v0 = vld [vmem:[%s459_s15] sm:$0xff]  ;;  %v1712_v1 = vld [vmem:[%s459_s15 + $0x8] sm:$0xff]  ;;  %v491_v3 = vlaneseq  ;;  %v1580_v27 = vmov 0   ;;  %vm601_vm11 = vcmask 1043456   ;;  %vm597_vm13 = vcmask 588800  }
  0x1a   : > { %v1376_v2 = vpack.i.bf16 %v1712_v1, %v1710_v0  ;;  %v490_v7 = vld [vmem:[%s2146_s2] sm:$0x3]  ;;  %640 = vmatprep.mubr.bf16.mxu0 %v1580_v27 }
  0x1b   : > { %v492_v4 = vshrl.u32 %v491_v3, 7  ;;  %v1720_v11 = vand.u32 127, %v491_v3  ;;  %v499_v28 = vld [vmem:[%s2147_s3] sm:$0x3] }
  0x1c   : > { %1377 = vrot.lane.b32.xlu0 %v1376_v2, %s1576_s28 }
  0x1d   : > { %v493_v5 = vsub.s32 0, %v492_v4  ;;  %v497_v6 = vsub.s32 1, %v492_v4  ;;  %vm522_vm2 = vcmp.lt.s32.totalorder %v1720_v11, 16  ;;  %vm529_vm3 = vcmp.lt.s32.totalorder %v1720_v11, 112 }
  0x1e   : > { %vm540_vm6 = vcmp.lt.s32.totalorder %v1720_v11, 1  ;;  %vm547_vm7 = vcmp.lt.s32.totalorder %v1720_v11, 127 }
  0x1f   : > { %v494_v9 = vrot.slane %v490_v7, %v493_v5  ;;  %v498_v10 = vrot.slane %v490_v7, %v497_v6  ;;  %v1738_v30 = vrot.slane %v499_v28, %v497_v6  ;;  %v1740_v32 = vrot.slane %v499_v28, %v493_v5 }
  0x20   : > { %1382 = vrot.lane.b32.xlu0 %v1376_v2, %s1577_s24 }
  0x21   : > { %vm510_vm0 = vcmp.eq.s32.totalorder %v494_v9, 15  ;;  %vm511_vm1 = vcmp.eq.s32.totalorder %v498_v10, 15  ;;  %vm508_vm4 = vcmp.eq.s32.totalorder %v494_v9, 0  ;;  %vm509_vm5 = vcmp.eq.s32.totalorder %v498_v10, 0 }
  0x22   : > { %vm515_vm8 = vcmp.eq.s32.totalorder %v1738_v30, 15  ;;  %vm514_vm9 = vcmp.eq.s32.totalorder %v1740_v32, 15  ;;  %vm513_vm10 = vcmp.eq.s32.totalorder %v1738_v30, 0  ;;  %vm512_vm12 = vcmp.eq.s32.totalorder %v1740_v32, 0 }
  0x24   : > { %1397 = vrot.lane.b32.xlu0 %v1376_v2, %s1578_s26 }
  0x8e   : > { %v1378_v8 = vpop.permute.xlu0 %1377 }
  0x8f   : > { %v1380_v12 = vunpack.i.h.bf16 %v1378_v8  ;;  %v1379_v13 = vunpack.i.l.bf16 %v1378_v8 }
  0x91   : > { %v523_v17 = vsel %vm522_vm2, %v1379_v13, %v1380_v12  ;;  %v524_v18 = vsel %vm522_vm2, %v1380_v12, %v1379_v13 }
  0x92   : > { %v1383_v14 = vpop.permute.xlu0 %1382 }
  0x93   : > { %v1385_v15 = vunpack.i.h.bf16 %v1383_v14  ;;  %v1384_v16 = vunpack.i.l.bf16 %v1383_v14 }
  0x95   : > { %v530_v19 = vsel %vm529_vm3, %v1384_v16, %v1385_v15  ;;  %v531_v20 = vsel %vm529_vm3, %v1385_v15, %v1384_v16 }
  0x96   : > { %v1724_v21 = vsel %vm510_vm0, %v524_v18, %v530_v19  ;;  %v535_v22 = vsel %vm511_vm1, %v523_v17, %v531_v20  ;;  %v1726_v23 = vsel %vm508_vm4, %v530_v19, %v524_v18  ;;  %v1728_v24 = vsel %vm509_vm5, %v531_v20, %v523_v17  ;;  %v1398_v31 = vpop.permute.xlu0 %1397  ;;  %v596_v20 = vld [vmem:[%s2148_s4] sm:$0xf] }
  0x97   : > { %v1386_v25 = vpack.i.bf16 %v535_v22, %v1724_v21  ;;  %v1406_v26 = vpack.i.bf16 %v1728_v24, %v1726_v23  ;;  %v1400_v35 = vunpack.i.h.bf16 %v1398_v31  ;;  %v1399_v36 = vunpack.i.l.bf16 %v1398_v31 }
  0x99   : > { %1387 = vrot.lane.b32.xlu1 %v1386_v25, %s1578_s26  ;;  %1407 = vrot.lane.b32.xlu0 %v1406_v26, %s1578_s26  ;;  %v558_v45 = vsel %vm540_vm6, %v1399_v36, %v1400_v35  ;;  %v559_v54 = vsel %vm540_vm6, %v1400_v35, %v1399_v36 }
  0x9d   : > { %1392 = vrot.lane.b32.xlu1 %v1386_v25, %s1579_s27 }
  0xa1   : > { %1402 = vrot.lane.b32.xlu1 %v1376_v2, %s1579_s27 }
  0xa5   : > { %1412 = vrot.lane.b32.xlu1 %v1406_v26, %s1579_s27 }
 0x10b   : > { %v1388_v29 = vpop.permute.xlu1 %1387  ;;  %v1408_v40 = vpop.permute.xlu0 %1407 }
 0x10c   : > { %v1390_v33 = vunpack.i.h.bf16 %v1388_v29  ;;  %v1389_v34 = vunpack.i.l.bf16 %v1388_v29  ;;  %v1410_v55 = vunpack.i.h.bf16 %v1408_v40  ;;  %v1409_v56 = vunpack.i.l.bf16 %v1408_v40 }
 0x10e   : > { %v574_v41 = vsel %vm540_vm6, %v1389_v34, %v1390_v33  ;;  %v575_v43 = vsel %vm540_vm6, %v1390_v33, %v1389_v34  ;;  %v541_v7 = vsel %vm540_vm6, %v1409_v56, %v1410_v55  ;;  %v542_v13 = vsel %vm540_vm6, %v1410_v55, %v1409_v56 }
 0x10f   : > { %v1393_v37 = vpop.permute.xlu1 %1392 }
 0x110   : > { %v1395_v38 = vunpack.i.h.bf16 %v1393_v37  ;;  %v1394_v39 = vunpack.i.l.bf16 %v1393_v37 }
 0x112   : > { %v581_v42 = vsel %vm547_vm7, %v1395_v38, %v1394_v39  ;;  %v580_v44 = vsel %vm547_vm7, %v1394_v39, %v1395_v38 }
 0x113   : > { %v1403_v46 = vpop.permute.xlu1 %1402  ;;  %v585_v47 = vsel %vm515_vm8, %v574_v41, %v581_v42  ;;  %v584_v48 = vsel %vm514_vm9, %v575_v43, %v580_v44  ;;  %v583_v49 = vsel %vm513_vm10, %v581_v42, %v574_v41  ;;  %v582_v57 = vsel %vm512_vm12, %v580_v44, %v575_v43 }
 0x114   : > { %v1405_v50 = vunpack.i.h.bf16 %v1403_v46  ;;  %v1404_v51 = vunpack.i.l.bf16 %v1403_v46  ;;  %v595_v52 = vpack.c.bf16 %v585_v47, %v585_v47  ;;  %v594_v53 = vpack.c.bf16 %v584_v48, %v584_v48 }
 0x115   : > { %v593_v61 = vpack.c.bf16 %v535_v22, %v583_v49  ;;  %v592_v6 = vpack.c.bf16 %v1724_v21, %v582_v57  ;;  %v1581_v21 = vmov 0.0  }
 0x116   : > { %v564_v58 = vsel %vm547_vm7, %v1404_v51, %v1405_v50  ;;  %v565_v59 = vsel %vm547_vm7, %v1405_v50, %v1404_v51  ;;  %1306 = vmatprep.subr.msk.bf16.mxu0 %vm601_vm11, %v595_v52  ;;  %v603_v60 = vsel %vm601_vm11, %v594_v53, 0  ;;  %651 = vst [vmem:[#allocation3 + $0x8] sm:$0xff] %v1581_v21  ;;  %652 = vst [vmem:[#allocation3] sm:$0xff] %v1581_v21 }
 0x117   : > { %615 = vmatpush1.bf16.msra.mxu0 %v603_v60  ;;  %v1413_v62 = vpop.permute.xlu1 %1412  ;;  %v569_v63 = vsel %vm515_vm8, %v558_v45, %v565_v59  ;;  %v568_v5 = vsel %vm514_vm9, %v559_v54, %v564_v58  ;;  %v567_v12 = vsel %vm513_vm10, %v565_v59, %v558_v45  ;;  %v566_v16 = vsel %vm512_vm12, %v564_v58, %v559_v54 }
 0x118   : > { %v1415_v2 = vunpack.i.h.bf16 %v1413_v62  ;;  %v1414_v3 = vunpack.i.l.bf16 %v1413_v62  ;;  %616 = vmatprep.subr.bf16.mxu0 %v593_v61  ;;  %v591_v4 = vpack.c.bf16 %v569_v63, %v1712_v1  ;;  %v590_v10 = vpack.c.bf16 %v568_v5, %v1710_v0 }
 0x11a   : > { %v549_v8 = vsel %vm547_vm7, %v1415_v2, %v1414_v3  ;;  %v548_v9 = vsel %vm547_vm7, %v1414_v3, %v1415_v2 }
 0x11b   : > { %617 = vmatpush1.bf16.msra.mxu0 %v592_v6  ;;  %v553_v1 = vsel %vm515_vm8, %v541_v7, %v549_v8  ;;  %v552_v15 = vsel %vm514_vm9, %v542_v13, %v548_v9  ;;  %v551_v0 = vsel %vm513_vm10, %v549_v8, %v541_v7  ;;  %v550_v19 = vsel %vm512_vm12, %v548_v9, %v542_v13 }
 0x11c   : > { %618 = vmatprep.subr.bf16.mxu0 %v591_v4  ;;  %v589_v14 = vpack.c.bf16 %v567_v12, %v553_v1  ;;  %v588_v17 = vpack.c.bf16 %v566_v16, %v552_v15  ;;  %v587_v18 = vpack.c.bf16 %v1728_v24, %v551_v0  ;;  %v586_v11 = vpack.c.bf16 %v1726_v23, %v550_v19 }
 0x11f   : > { %619 = vmatpush1.bf16.msra.mxu0 %v590_v10 }
 0x120   : > { %620 = vmatprep.subr.bf16.mxu0 %v589_v14 }
 0x123   : > { %621 = vmatpush1.bf16.msra.mxu0 %v588_v17 }
 0x124   : > { %622 = vmatprep.subr.bf16.mxu0 %v587_v18 }
 0x127   : > { %623 = vmatpush1.bf16.msra.mxu0 %v586_v11 }
 0x12a   : > { %1307 = vmatmul.mubr.msk.bf16.vlgmr.msra.gmra.mxu0 %vm597_vm13, %v596_v20 }
 0x1ea   : > { %v642_v22 = vpop.f32.mrf.mxu0 }
 0x1eb   : > { %649 = vst [vmem:[#allocation2] sm:$0xff] %v642_v22 }
 0x1ec   : > { %v644_v24 = vpop.f32.mrf.mxu0 }
 0x1ed   : > { %650 = vst [vmem:[#allocation2 + $0x8] sm:$0xff] %v644_v24 }
 0x1ee   : > { %v646_v25 = vpop.f32.mrf.mxu0 }
 0x1f0   : > { %v647_v26 = vpop.f32.mrf.mxu0 }
 0x1f1 PF: > { %v1807_v23 = vld [vmem:[%s1702_s23] sm:$0xff]  ;;  %v1810_v27 = vld [vmem:[%s1702_s23 + $0x8] sm:$0xff]  ;;  %s1582_s15 = smov 16   ;;  %s1583_s16 = smov 112   ;;  %v656_v29 = vlaneseq  ;;  %v1586_v53 = vmov 0   ;;  %vm766_vm9 = vcmask 1043456  }
 0x1f2   : > { %v1416_v28 = vpack.i.bf16 %v1810_v27, %v1807_v23  ;;  %s1584_s17 = smov 1   ;;  %v655_v33 = vld [vmem:[%s2146_s2] sm:$0x3]  ;;  %s1585_s19 = smov 127   ;;  %805 = vmatprep.mubr.bf16.mxu0 %v1586_v53  ;;  %974 = vmatprep.mubr.bf16.mxu1 %v1586_v53  ;;  %vm762_vm11 = vcmask 588800  }
 0x1f3   : > { %v657_v30 = vshrl.u32 %v656_v29, 7  ;;  %v1826_v37 = vand.u32 127, %v656_v29  ;;  %v664_v54 = vld [vmem:[%s2147_s3] sm:$0x3]  ;;  %p1312_p8 = scmp.ne.s32.totalorder %s1558_s21, 2 }
 0x1f4   : > { %1417 = vrot.lane.b32.xlu0 %v1416_v28, %s1582_s15  ;;  %s1587_s26 = smov (!%p1312_p8), 16   ;;  %s1588_s8 = smov (!%p1312_p8), 112  }
 0x1f5   : > { %v1817_v31 = vsub.s32 0, %v657_v30  ;;  %v1819_v32 = vsub.s32 1, %v657_v30  ;;  %vm687_vm0 = vcmp.lt.s32.totalorder %v1826_v37, 16  ;;  %vm694_vm1 = vcmp.lt.s32.totalorder %v1826_v37, 112  ;;  %s1589_s25 = smov (!%p1312_p8), 1   ;;  %s1590_s21 = smov (!%p1312_p8), 127  }
 0x1f6   : > { %vm705_vm4 = vcmp.lt.s32.totalorder %v1826_v37, 1  ;;  %vm712_vm5 = vcmp.lt.s32.totalorder %v1826_v37, 127 }
 0x1f7   : > { %v659_v35 = vrot.slane %v655_v33, %v1817_v31  ;;  %v663_v36 = vrot.slane %v655_v33, %v1819_v32  ;;  %v1856_v56 = vrot.slane %v664_v54, %v1819_v32  ;;  %v1859_v58 = vrot.slane %v664_v54, %v1817_v31  ;;  %v815_v54 = vld [vmem:[#allocation2 + $0x8] sm:$0xff] }
 0x1f8   : > { %1422 = vrot.lane.b32.xlu0 %v1416_v28, %s1583_s16 }
 0x1f9   : > { %vm675_vm14 = vcmp.eq.s32.totalorder %v659_v35, 15  ;;  %vm676_vm15 = vcmp.eq.s32.totalorder %v663_v36, 15  ;;  %vm673_vm2 = vcmp.eq.s32.totalorder %v659_v35, 0  ;;  %vm674_vm3 = vcmp.eq.s32.totalorder %v663_v36, 0 }
 0x1fa   : > { %vm680_vm6 = vcmp.eq.s32.totalorder %v1856_v56, 15  ;;  %vm679_vm7 = vcmp.eq.s32.totalorder %v1859_v58, 15  ;;  %vm678_vm8 = vcmp.eq.s32.totalorder %v1856_v56, 0  ;;  %vm677_vm10 = vcmp.eq.s32.totalorder %v1859_v58, 0 }
 0x1fc   : > { %1437 = vrot.lane.b32.xlu0 %v1416_v28, %s1584_s17 }
 0x266   : > { %v1418_v34 = vpop.permute.xlu0 %1417 }
 0x267   : > { %v1420_v38 = vunpack.i.h.bf16 %v1418_v34  ;;  %v1419_v39 = vunpack.i.l.bf16 %v1418_v34 }
 0x269   : > { %v688_v43 = vsel %vm687_vm0, %v1419_v39, %v1420_v38  ;;  %v689_v44 = vsel %vm687_vm0, %v1420_v38, %v1419_v39 }
 0x26a   : > { %v1423_v40 = vpop.permute.xlu0 %1422 }
 0x26b   : > { %v1425_v41 = vunpack.i.h.bf16 %v1423_v40  ;;  %v1424_v42 = vunpack.i.l.bf16 %v1423_v40 }
 0x26d   : > { %v695_v45 = vsel %vm694_vm1, %v1424_v42, %v1425_v41  ;;  %v696_v46 = vsel %vm694_vm1, %v1425_v41, %v1424_v42 }
 0x26e   : > { %v1838_v47 = vsel %vm675_vm14, %v689_v44, %v695_v45  ;;  %v700_v48 = vsel %vm676_vm15, %v688_v43, %v696_v46  ;;  %v1840_v49 = vsel %vm673_vm2, %v695_v45, %v689_v44  ;;  %v1842_v50 = vsel %vm674_vm3, %v696_v46, %v688_v43  ;;  %v1438_v57 = vpop.permute.xlu0 %1437 }
 0x26f   : > { %v1426_v51 = vpack.i.bf16 %v700_v48, %v1838_v47  ;;  %v1446_v52 = vpack.i.bf16 %v1842_v50, %v1840_v49  ;;  %v1440_v61 = vunpack.i.h.bf16 %v1438_v57  ;;  %v1439_v62 = vunpack.i.l.bf16 %v1438_v57 }
 0x271   : > { %1427 = vrot.lane.b32.xlu1 %v1426_v51, %s1584_s17  ;;  %1447 = vrot.lane.b32.xlu0 %v1446_v52, %s1584_s17  ;;  %v723_v9 = vsel %vm705_vm4, %v1439_v62, %v1440_v61  ;;  %v724_v17 = vsel %vm705_vm4, %v1440_v61, %v1439_v62 }
 0x275   : > { %1432 = vrot.lane.b32.xlu1 %v1426_v51, %s1585_s19  ;;  %v761_v51 = vld [vmem:[%s2149_s5] sm:$0xf] }
 0x279   : > { %1442 = vrot.lane.b32.xlu1 %v1416_v28, %s1585_s19 }
 0x27d   : > { %1452 = vrot.lane.b32.xlu1 %v1446_v52, %s1585_s19  ;;  %v814_v52 = vld [vmem:[#allocation2] sm:$0xff] }
 0x2e3   : > { %v1428_v55 = vpop.permute.xlu1 %1427  ;;  %v1448_v4 = vpop.permute.xlu0 %1447 }
 0x2e4   : > { %v1430_v59 = vunpack.i.h.bf16 %v1428_v55  ;;  %v1429_v60 = vunpack.i.l.bf16 %v1428_v55  ;;  %v1450_v18 = vunpack.i.h.bf16 %v1448_v4  ;;  %v1449_v19 = vunpack.i.l.bf16 %v1448_v4 }
 0x2e6   : > { %v739_v5 = vsel %vm705_vm4, %v1429_v60, %v1430_v59  ;;  %v740_v7 = vsel %vm705_vm4, %v1430_v59, %v1429_v60  ;;  %v706_v35 = vsel %vm705_vm4, %v1449_v19, %v1450_v18  ;;  %v707_v41 = vsel %vm705_vm4, %v1450_v18, %v1449_v19  ;;  %v824_v59 = vld [vmem:[#allocation3 + $0x8] sm:$0xff] }
 0x2e7   : > { %v1433_v63 = vpop.permute.xlu1 %1432 }
 0x2e8   : > { %v1435_v2 = vunpack.i.h.bf16 %v1433_v63  ;;  %v1434_v3 = vunpack.i.l.bf16 %v1433_v63  ;;  %v825_v63 = vld [vmem:[#allocation3] sm:$0xff] }
 0x2ea   : > { %v746_v6 = vsel %vm712_vm5, %v1435_v2, %v1434_v3  ;;  %v745_v8 = vsel %vm712_vm5, %v1434_v3, %v1435_v2 }
 0x2eb   : > { %v1443_v10 = vpop.permute.xlu1 %1442  ;;  %v750_v1 = vsel %vm680_vm6, %v739_v5, %v746_v6  ;;  %v749_v12 = vsel %vm679_vm7, %v740_v7, %v745_v8  ;;  %v748_v13 = vsel %vm678_vm8, %v746_v6, %v739_v5  ;;  %v747_v11 = vsel %vm677_vm10, %v745_v8, %v740_v7  ;;  %v831_v7 = vld [vmem:[%s2146_s2] sm:$0x3] }
 0x2ec   : > { %v1445_v14 = vunpack.i.h.bf16 %v1443_v10  ;;  %v1444_v15 = vunpack.i.l.bf16 %v1443_v10  ;;  %v760_v16 = vpack.c.bf16 %v750_v1, %v750_v1  ;;  %v759_v0 = vpack.c.bf16 %v749_v12, %v749_v12 }
 0x2ed   : > { %v758_v24 = vpack.c.bf16 %v700_v48, %v748_v13  ;;  %v757_v34 = vpack.c.bf16 %v1838_v47, %v747_v11  ;;  %v835_v8 = vrot.slane %v831_v7, %v1817_v31 }
 0x2ee   : > { %v729_v20 = vsel %vm712_vm5, %v1444_v15, %v1445_v14  ;;  %v730_v21 = vsel %vm712_vm5, %v1445_v14, %v1444_v15  ;;  %1308 = vmatprep.subr.msk.bf16.mxu0 %vm766_vm9, %v760_v16  ;;  %v768_v22 = vsel %vm766_vm9, %v759_v0, 0 }
 0x2ef   : > { %780 = vmatpush1.bf16.msra.mxu0 %v768_v22  ;;  %v1453_v25 = vpop.permute.xlu1 %1452  ;;  %v734_v26 = vsel %vm680_vm6, %v723_v9, %v730_v21  ;;  %v733_v33 = vsel %vm679_vm7, %v724_v17, %v729_v20  ;;  %v732_v40 = vsel %vm678_vm8, %v730_v21, %v723_v9  ;;  %v731_v44 = vsel %vm677_vm10, %v729_v20, %v724_v17 }
 0x2f0   : > { %v1455_v28 = vunpack.i.h.bf16 %v1453_v25  ;;  %v1454_v29 = vunpack.i.l.bf16 %v1453_v25  ;;  %781 = vmatprep.subr.bf16.mxu0 %v758_v24  ;;  %v756_v30 = vpack.c.bf16 %v734_v26, %v1810_v27  ;;  %v755_v39 = vpack.c.bf16 %v733_v33, %v1807_v23  ;;  %v840_v25 = vld [vmem:[%s2147_s3] sm:$0x3] }
 0x2f1   : > { %v839_v9 = vrot.slane %v831_v7, %v1819_v32  ;;  %vm851_vm12 = vcmp.eq.s32.totalorder %v835_v8, 15  ;;  %vm849_vm14 = vcmp.eq.s32.totalorder %v835_v8, 0  ;;  %v848_v26 = vrot.slane %v840_v25, %v1819_v32 }
 0x2f2   : > { %v714_v36 = vsel %vm712_vm5, %v1455_v28, %v1454_v29  ;;  %v713_v38 = vsel %vm712_vm5, %v1454_v29, %v1455_v28  ;;  %v1975_v28 = vrot.slane %v840_v25, %v1817_v31 }
 0x2f3   : > { %782 = vmatpush1.bf16.msra.mxu0 %v757_v34  ;;  %v718_v27 = vsel %vm680_vm6, %v706_v35, %v714_v36  ;;  %v717_v43 = vsel %vm679_vm7, %v707_v41, %v713_v38  ;;  %v716_v23 = vsel %vm678_vm8, %v714_v36, %v706_v35  ;;  %v715_v47 = vsel %vm677_vm10, %v713_v38, %v707_v41 }
 0x2f4   : > { %783 = vmatprep.subr.bf16.mxu0 %v756_v30  ;;  %v754_v42 = vpack.c.bf16 %v732_v40, %v718_v27  ;;  %v753_v45 = vpack.c.bf16 %v731_v44, %v717_v43  ;;  %v752_v46 = vpack.c.bf16 %v1842_v50, %v716_v23  ;;  %v751_v48 = vpack.c.bf16 %v1840_v49, %v715_v47  ;;  %v818_v50 = vld [vmem:[%s2150_s6] sm:$0xff]  ;;  %v819_v49 = vld [vmem:[%s2150_s6 + $0x8] sm:$0xff] }
 0x2f5   : > { %vm852_vm13 = vcmp.eq.s32.totalorder %v839_v9, 15  ;;  %vm850_vm15 = vcmp.eq.s32.totalorder %v839_v9, 0  ;;  %vm856_vm2 = vcmp.eq.s32.totalorder %v848_v26, 15  ;;  %vm855_vm3 = vcmp.eq.s32.totalorder %v1975_v28, 15 }
 0x2f6   : > { %vm854_vm6 = vcmp.eq.s32.totalorder %v848_v26, 0  ;;  %vm853_vm7 = vcmp.eq.s32.totalorder %v1975_v28, 0 }
 0x2f7   : > { %784 = vmatpush1.bf16.msra.mxu0 %v755_v39 }
 0x2f8   : > { %785 = vmatprep.subr.bf16.mxu0 %v754_v42 }
 0x2fb   : > { %786 = vmatpush1.bf16.msra.mxu0 %v753_v45 }
 0x2fc   : > { %787 = vmatprep.subr.bf16.mxu0 %v752_v46 }
 0x2ff   : > { %788 = vmatpush1.bf16.msra.mxu0 %v751_v48 }
 0x302   : > { %1309 = vmatmul.mubr.msk.bf16.vlgmr.msra.gmra.mxu0 %vm762_vm11, %v761_v51 }
 0x3c2   : > { %v807_v53 = vpop.f32.mrf.mxu0 }
 0x3c3   : > { %v816_v55 = vadd.f32 %v814_v52, %v807_v53 }
 0x3c4   : > { %v809_v56 = vpop.f32.mrf.mxu0 }
 0x3c5   : > { %v820_v57 = vadd.f32 %v818_v50, %v816_v55  ;;  %v817_v58 = vadd.f32 %v815_v54, %v809_v56 }
 0x3c6   : > { %v811_v60 = vpop.f32.mrf.mxu0 }
 0x3c7   : > { %v1932_v61 = vmax.f32 %v820_v57, 0.0  ;;  %v821_v62 = vadd.f32 %v819_v49, %v817_v58 }
 0x3c8   : > { %v812_v2 = vpop.f32.mrf.mxu0 }
 0x3c9   : > { %v826_v3 = vadd.f32 %v824_v59, %v1932_v61  ;;  %v1935_v4 = vmax.f32 %v821_v62, 0.0 }
 0x3cb   : > { %828 = vst [vmem:[#allocation3 + $0x8] sm:$0xff] %v826_v3  ;;  %v827_v5 = vadd.f32 %v825_v63, %v1935_v4  ;;  %v1461_v6 = vpack.i.bf16 %v1935_v4, %v1932_v61 }
 0x3cd   : > { %829 = vst [vmem:[#allocation3] sm:$0xff] %v827_v5  ;;  %1462 = vrot.lane.b32.xlu1 %v1461_v6, %s1583_s16  ;;  %1457 = vrot.lane.b32.xlu0 %v1461_v6, %s1582_s15 }
 0x43f   : > { %v1463_v10 = vpop.permute.xlu1 %1462  ;;  %v1458_v1 = vpop.permute.xlu0 %1457 }
 0x440   : > { %v1465_v12 = vunpack.i.h.bf16 %v1463_v10  ;;  %v1464_v13 = vunpack.i.l.bf16 %v1463_v10  ;;  %v1460_v14 = vunpack.i.h.bf16 %v1458_v1  ;;  %v1459_v15 = vunpack.i.l.bf16 %v1458_v1 }
 0x442   : > { %v867_v16 = vsel %vm694_vm1, %v1464_v13, %v1465_v12  ;;  %v868_v0 = vsel %vm694_vm1, %v1465_v12, %v1464_v13  ;;  %v861_v17 = vsel %vm687_vm0, %v1459_v15, %v1460_v14  ;;  %v862_v18 = vsel %vm687_vm0, %v1460_v14, %v1459_v15 }
 0x443   : > { %v1955_v19 = vsel %vm851_vm12, %v862_v18, %v867_v16  ;;  %v872_v11 = vsel %vm852_vm13, %v861_v17, %v868_v0  ;;  %v1960_v21 = vsel %vm849_vm14, %v867_v16, %v862_v18  ;;  %v1962_v22 = vsel %vm850_vm15, %v868_v0, %v861_v17 }
 0x444   : > { %v1471_v20 = vpack.i.bf16 %v872_v11, %v1955_v19  ;;  %v1491_v24 = vpack.i.bf16 %v1962_v22, %v1960_v21 }
 0x446   : > { %1472 = vrot.lane.b32.xlu1 %v1471_v20, %s1585_s19  ;;  %1467 = vrot.lane.b32.xlu0 %v1471_v20, %s1584_s17  ;;  %v931_v20 = vld [vmem:[%s2154_s10] sm:$0xff] }
 0x44a   : > { %1482 = vrot.lane.b32.xlu1 %v1461_v6, %s1585_s19  ;;  %1477 = vrot.lane.b32.xlu0 %v1461_v6, %s1584_s17 }
 0x44e   : > { %1492 = vrot.lane.b32.xlu1 %v1491_v24, %s1585_s19  ;;  %1487 = vrot.lane.b32.xlu0 %v1491_v24, %s1584_s17  ;;  %v932_v24 = vld [vmem:[%s2154_s10 + $0x8] sm:$0xff]  ;;  %s2167_s17 = sld [smem:[#allocation9_spill]] (!%p1312_p8) }
 0x4b8   : > { %v1473_v29 = vpop.permute.xlu1 %1472  ;;  %v1468_v30 = vpop.permute.xlu0 %1467 }
 0x4b9   : > { %v1475_v33 = vunpack.i.h.bf16 %v1473_v29  ;;  %v1474_v34 = vunpack.i.l.bf16 %v1473_v29  ;;  %v1470_v35 = vunpack.i.h.bf16 %v1468_v30  ;;  %v1469_v36 = vunpack.i.l.bf16 %v1468_v30 }
 0x4bb   : > { %v909_v38 = vsel %vm705_vm4, %v1469_v36, %v1470_v35  ;;  %v916_v39 = vsel %vm712_vm5, %v1475_v33, %v1474_v34  ;;  %v910_v27 = vsel %vm705_vm4, %v1470_v35, %v1469_v36  ;;  %v915_v40 = vsel %vm712_vm5, %v1474_v34, %v1475_v33 }
 0x4bc   : > { %v1483_v41 = vpop.permute.xlu1 %1482  ;;  %v1478_v42 = vpop.permute.xlu0 %1477  ;;  %v920_v43 = vsel %vm856_vm2, %v909_v38, %v916_v39  ;;  %v919_v44 = vsel %vm855_vm3, %v910_v27, %v915_v40  ;;  %v918_v23 = vsel %vm854_vm6, %v916_v39, %v909_v38  ;;  %v917_v55 = vsel %vm853_vm7, %v915_v40, %v910_v27 }
 0x4bd   : > { %v1485_v45 = vunpack.i.h.bf16 %v1483_v41  ;;  %v1484_v46 = vunpack.i.l.bf16 %v1483_v41  ;;  %v1480_v47 = vunpack.i.h.bf16 %v1478_v42  ;;  %v1479_v48 = vunpack.i.l.bf16 %v1478_v42 }
 0x4be   : > { %v930_v51 = vpack.c.bf16 %v920_v43, %v920_v43  ;;  %v929_v52 = vpack.c.bf16 %v919_v44, %v919_v44  ;;  %v928_v54 = vpack.c.bf16 %v872_v11, %v918_v23  ;;  %v927_v7 = vpack.c.bf16 %v1955_v19, %v917_v55  ;;  %v830_v11 = vld [vmem:[%s2153_s9] sm:$0xf] }
 0x4bf   : > { %v900_v53 = vsel %vm712_vm5, %v1485_v45, %v1484_v46  ;;  %v893_v50 = vsel %vm705_vm4, %v1479_v48, %v1480_v47  ;;  %v899_v56 = vsel %vm712_vm5, %v1484_v46, %v1485_v45  ;;  %v894_v49 = vsel %vm705_vm4, %v1480_v47, %v1479_v48 }
 0x4c0   : > { %1310 = vmatprep.subr.msk.bf16.mxu1 %vm766_vm9, %v930_v51  ;;  %v937_v57 = vsel %vm766_vm9, %v929_v52, 0  ;;  %v1493_v58 = vpop.permute.xlu1 %1492  ;;  %v1488_v59 = vpop.permute.xlu0 %1487  ;;  %v904_v60 = vsel %vm856_vm2, %v893_v50, %v900_v53  ;;  %v903_v9 = vsel %vm855_vm3, %v894_v49, %v899_v56  ;;  %v902_v14 = vsel %vm854_vm6, %v900_v53, %v893_v50 }
 0x4c1   : > { %949 = vmatpush1.bf16.msra.mxu1 %v937_v57  ;;  %v1495_v62 = vunpack.i.h.bf16 %v1493_v58  ;;  %v1494_v63 = vunpack.i.l.bf16 %v1493_v58  ;;  %v1490_v2 = vunpack.i.h.bf16 %v1488_v59  ;;  %v1489_v3 = vunpack.i.l.bf16 %v1488_v59 }
 0x4c2   : > { %950 = vmatprep.subr.bf16.mxu1 %v928_v54  ;;  %v926_v8 = vpack.c.bf16 %v904_v60, %v1935_v4  ;;  %v925_v13 = vpack.c.bf16 %v903_v9, %v1932_v61  ;;  %v901_v0 = vsel %vm853_vm7, %v899_v56, %v894_v49 }
 0x4c3   : > { %v884_v5 = vsel %vm712_vm5, %v1495_v62, %v1494_v63  ;;  %v877_v6 = vsel %vm705_vm4, %v1489_v3, %v1490_v2  ;;  %v883_v10 = vsel %vm712_vm5, %v1494_v63, %v1495_v62  ;;  %v878_v1 = vsel %vm705_vm4, %v1490_v2, %v1489_v3 }
 0x4c4   : > { %v888_v12 = vsel %vm856_vm2, %v877_v6, %v884_v5  ;;  %v887_v4 = vsel %vm855_vm3, %v878_v1, %v883_v10  ;;  %v886_v16 = vsel %vm854_vm6, %v884_v5, %v877_v6  ;;  %v885_v61 = vsel %vm853_vm7, %v883_v10, %v878_v1 }
 0x4c5   : > { %951 = vmatpush1.bf16.msra.mxu1 %v927_v7  ;;  %v924_v15 = vpack.c.bf16 %v902_v14, %v888_v12  ;;  %v923_v17 = vpack.c.bf16 %v901_v0, %v887_v4  ;;  %v922_v18 = vpack.c.bf16 %v1962_v22, %v886_v16  ;;  %v921_v19 = vpack.c.bf16 %v1960_v21, %v885_v61 }
 0x4c6   : > { %952 = vmatprep.subr.bf16.mxu1 %v926_v8 }
 0x4c9   : > { %953 = vmatpush1.bf16.msra.mxu1 %v925_v13 }
 0x4ca   : > { %954 = vmatprep.subr.bf16.mxu1 %v924_v15 }
 0x4cd   : > { %955 = vmatpush1.bf16.msra.mxu1 %v923_v17 }
 0x4ce   : > { %956 = vmatprep.subr.bf16.mxu1 %v922_v18 }
 0x4d1   : > { %957 = vmatpush1.bf16.msra.mxu1 %v921_v19 }
 0x4d4   : > { %1311 = vmatmul.mubr.msk.bf16.vlgmr.msra.gmra.mxu1 %vm762_vm11, %v830_v11 }
 0x594   : > { %v976_v22 = vpop.f32.mrf.mxu1 }
 0x595   : > { %v977_v25 = vadd.f32 %v976_v22, %v931_v20 }
 0x596   : > { %v978_v26 = vpop.f32.mrf.mxu1 }
 0x597   : > { %v983_v28 = vmax.f32 %v977_v25, 0.0  ;;  %v979_v21 = vadd.f32 %v978_v26, %v932_v24  ;;  %990 = sbr.rel (%p1312_p8) target bundleno = 1911 (0x777), region = 72 }
 0x598   : > { %v980_v29 = vpop.f32.mrf.mxu1 }
 0x599   : > { %985 = vst [vmem:[%s1707_s22] sm:$0xff] %v983_v28  ;;  %v984_v30 = vmax.f32 %v979_v21, 0.0 }
 0x59a   : > { %v981_v33 = vpop.f32.mrf.mxu1 }
 0x59b   : > { %986 = vst [vmem:[%s1707_s22 + $0x8] sm:$0xff] %v984_v30 }
 0x59c   : > { %v991_v34 = vld [vmem:[#allocation3 + $0x8] sm:$0xff]  ;;  %v992_v35 = vld [vmem:[#allocation3] sm:$0xff]  ;;  %v996_v27 = vld [vmem:[%s2146_s2] sm:$0x3]  ;;  %v1591_v57 = vmov 0  }
 0x59d   : > { %v2041_v36 = vmul.f32 0.33333334, %v991_v34  ;;  %v2043_v38 = vmul.f32 0.33333334, %v992_v35  ;;  %v1000_v41 = vrot.slane %v996_v27, %v1817_v31  ;;  %v1004_v42 = vrot.slane %v996_v27, %v1819_v32  ;;  %1139 = vmatprep.mubr.bf16.mxu0 %v1591_v57  ;;  %v1005_v58 = vld [vmem:[%s2147_s3] sm:$0x3] }
 0x59e   : > { %v1013_v60 = vrot.slane %v1005_v58, %v1819_v32  ;;  %v1009_v63 = vrot.slane %v1005_v58, %v1817_v31 }
 0x59f   : > { %v1496_v39 = vpack.i.bf16 %v2043_v38, %v2041_v36  ;;  %vm1014_vm8 = vcmp.eq.s32.totalorder %v1000_v41, 0  ;;  %vm1015_vm10 = vcmp.eq.s32.totalorder %v1004_v42, 0  ;;  %vm1016_vm12 = vcmp.eq.s32.totalorder %v1000_v41, 15 }
 0x5a0   : > { %vm1017_vm13 = vcmp.eq.s32.totalorder %v1004_v42, 15  ;;  %vm1020_vm14 = vcmp.eq.s32.totalorder %v1009_v63, 15  ;;  %vm1018_vm15 = vcmp.eq.s32.totalorder %v1009_v63, 0 }
 0x5a1   : > { %1497 = vrot.lane.b32.xlu0 %v1496_v39, %s1587_s26 }
 0x5a5   : > { %1502 = vrot.lane.b32.xlu0 %v1496_v39, %s1588_s8 }
 0x5a9   : > { %1517 = vrot.lane.b32.xlu0 %v1496_v39, %s1589_s25 }
 0x613   : > { %v1498_v40 = vpop.permute.xlu0 %1497 }
 0x614   : > { %v1500_v43 = vunpack.i.h.bf16 %v1498_v40  ;;  %v1499_v44 = vunpack.i.l.bf16 %v1498_v40 }
 0x616   : > { %v1026_v47 = vsel %vm687_vm0, %v1499_v44, %v1500_v43  ;;  %v1027_v48 = vsel %vm687_vm0, %v1500_v43, %v1499_v44  ;;  %vm1019_vm0 = vcmp.eq.s32.totalorder %v1013_v60, 0 }
 0x617   : > { %v1503_v23 = vpop.permute.xlu0 %1502 }
 0x618   : > { %v1505_v45 = vunpack.i.h.bf16 %v1503_v23  ;;  %v1504_v46 = vunpack.i.l.bf16 %v1503_v23 }
 0x61a   : > { %v1032_v51 = vsel %vm694_vm1, %v1504_v46, %v1505_v45  ;;  %v1033_v52 = vsel %vm694_vm1, %v1505_v45, %v1504_v46  ;;  %vm1021_vm1 = vcmp.eq.s32.totalorder %v1013_v60, 15 }
 0x61b   : > { %v2060_v53 = vsel %vm1014_vm8, %v1032_v51, %v1027_v48  ;;  %v2062_v50 = vsel %vm1015_vm10, %v1033_v52, %v1026_v47  ;;  %v2064_v54 = vsel %vm1016_vm12, %v1027_v48, %v1032_v51  ;;  %v1037_v55 = vsel %vm1017_vm13, %v1026_v47, %v1033_v52  ;;  %v1518_v62 = vpop.permute.xlu0 %1517  ;;  %v995_v52 = vld [vmem:[%s2151_s7] sm:$0xf] }
 0x61c   : > { %v1506_v56 = vpack.i.bf16 %v1037_v55, %v2064_v54  ;;  %v1526_v49 = vpack.i.bf16 %v2062_v50, %v2060_v53  ;;  %v1520_v5 = vunpack.i.h.bf16 %v1518_v62  ;;  %v1519_v6 = vunpack.i.l.bf16 %v1518_v62 }
 0x61e   : > { %1507 = vrot.lane.b32.xlu1 %v1506_v56, %s1589_s25  ;;  %1527 = vrot.lane.b32.xlu0 %v1526_v49, %s1589_s25  ;;  %v1058_v13 = vsel %vm705_vm4, %v1519_v6, %v1520_v5  ;;  %v1059_v19 = vsel %vm705_vm4, %v1520_v5, %v1519_v6 }
 0x622   : > { %1512 = vrot.lane.b32.xlu1 %v1506_v56, %s1590_s21 }
 0x626   : > { %1522 = vrot.lane.b32.xlu1 %v1496_v39, %s1590_s21 }
 0x62a   : > { %1532 = vrot.lane.b32.xlu1 %v1526_v49, %s1590_s21 }
 0x690   : > { %v1508_v59 = vpop.permute.xlu1 %1507  ;;  %v1528_v10 = vpop.permute.xlu0 %1527 }
 0x691   : > { %v1510_v2 = vunpack.i.h.bf16 %v1508_v59  ;;  %v1509_v3 = vunpack.i.l.bf16 %v1508_v59  ;;  %v1530_v11 = vunpack.i.h.bf16 %v1528_v10  ;;  %v1529_v20 = vunpack.i.l.bf16 %v1528_v10 }
 0x693   : > { %v1074_v1 = vsel %vm705_vm4, %v1509_v3, %v1510_v2  ;;  %v1075_v31 = vsel %vm705_vm4, %v1510_v2, %v1509_v3  ;;  %v1042_v27 = vsel %vm705_vm4, %v1529_v20, %v1530_v11  ;;  %v1043_v44 = vsel %vm705_vm4, %v1530_v11, %v1529_v20 }
 0x694   : > { %v1513_v7 = vpop.permute.xlu1 %1512 }
 0x695   : > { %v1515_v8 = vunpack.i.h.bf16 %v1513_v7  ;;  %v1514_v9 = vunpack.i.l.bf16 %v1513_v7 }
 0x697   : > { %v1081_v32 = vsel %vm712_vm5, %v1515_v8, %v1514_v9  ;;  %v1080_v12 = vsel %vm712_vm5, %v1514_v9, %v1515_v8 }
 0x698   : > { %v1523_v14 = vpop.permute.xlu1 %1522  ;;  %v1083_v15 = vsel %vm1019_vm0, %v1081_v32, %v1074_v1  ;;  %v1085_v4 = vsel %vm1021_vm1, %v1074_v1, %v1081_v32  ;;  %v1084_v16 = vsel %vm1020_vm14, %v1075_v31, %v1080_v12  ;;  %v1082_v22 = vsel %vm1018_vm15, %v1080_v12, %v1075_v31 }
 0x699   : > { %v1525_v0 = vunpack.i.h.bf16 %v1523_v14  ;;  %v1524_v17 = vunpack.i.l.bf16 %v1523_v14  ;;  %v1095_v18 = vpack.c.bf16 %v1085_v4, %v1085_v4  ;;  %v1094_v61 = vpack.c.bf16 %v1084_v16, %v1084_v16 }
 0x69a   : > { %v1093_v28 = vpack.c.bf16 %v1037_v55, %v1083_v15  ;;  %v1092_v39 = vpack.c.bf16 %v2064_v54, %v1082_v22  ;;  %v1096_v54 = vld [vmem:[%s2167_s17] sm:$0xff] }
 0x69b   : > { %v1064_v24 = vsel %vm712_vm5, %v1524_v17, %v1525_v0  ;;  %v1065_v25 = vsel %vm712_vm5, %v1525_v0, %v1524_v17  ;;  %1313 = vmatprep.subr.msk.bf16.mxu0 %vm766_vm9, %v1095_v18  ;;  %v1102_v26 = vsel %vm766_vm9, %v1094_v61, 0 }
 0x69c   : > { %v1069_v21 = vsel %vm1021_vm1, %v1058_v13, %v1065_v25  ;;  %1114 = vmatpush1.bf16.msra.mxu0 %v1102_v26  ;;  %v1533_v29 = vpop.permute.xlu1 %1532  ;;  %v1068_v35 = vsel %vm1020_vm14, %v1059_v19, %v1064_v24  ;;  %v1066_v46 = vsel %vm1018_vm15, %v1064_v24, %v1059_v19 }
 0x69d   : > { %v1535_v30 = vunpack.i.h.bf16 %v1533_v29  ;;  %v1534_v33 = vunpack.i.l.bf16 %v1533_v29  ;;  %1115 = vmatprep.subr.bf16.mxu0 %v1093_v28  ;;  %v1091_v34 = vpack.c.bf16 %v1069_v21, %v2043_v38  ;;  %v1090_v43 = vpack.c.bf16 %v1068_v35, %v2041_v36 }
 0x69e   : > { %v1067_v38 = vsel %vm1019_vm0, %v1065_v25, %v1058_v13 }
 0x69f   : > { %v1049_v40 = vsel %vm712_vm5, %v1535_v30, %v1534_v33  ;;  %v1048_v41 = vsel %vm712_vm5, %v1534_v33, %v1535_v30 }
 0x6a0   : > { %v1053_v42 = vsel %vm1021_vm1, %v1042_v27, %v1049_v40  ;;  %1116 = vmatpush1.bf16.msra.mxu0 %v1092_v39  ;;  %v1052_v23 = vsel %vm1020_vm14, %v1043_v44, %v1048_v41  ;;  %v1051_v47 = vsel %vm1019_vm0, %v1049_v40, %v1042_v27  ;;  %v1050_v51 = vsel %vm1018_vm15, %v1048_v41, %v1043_v44 }
 0x6a1   : > { %1117 = vmatprep.subr.bf16.mxu0 %v1091_v34  ;;  %v1089_v45 = vpack.c.bf16 %v1067_v38, %v1053_v42  ;;  %v1088_v48 = vpack.c.bf16 %v1066_v46, %v1052_v23  ;;  %v1087_v36 = vpack.c.bf16 %v2062_v50, %v1051_v47  ;;  %v1086_v37 = vpack.c.bf16 %v2060_v53, %v1050_v51  ;;  %v1097_v50 = vld [vmem:[%s2167_s17 + $0x8] sm:$0xff] }
 0x6a4   : > { %1118 = vmatpush1.bf16.msra.mxu0 %v1090_v43 }
 0x6a5   : > { %1119 = vmatprep.subr.bf16.mxu0 %v1089_v45 }
 0x6a8   : > { %1120 = vmatpush1.bf16.msra.mxu0 %v1088_v48 }
 0x6a9   : > { %1121 = vmatprep.subr.bf16.mxu0 %v1087_v36 }
 0x6ac   : > { %1122 = vmatpush1.bf16.msra.mxu0 %v1086_v37 }
 0x6af   : > { %1314 = vmatmul.mubr.msk.bf16.vlgmr.msra.gmra.mxu0 %vm762_vm11, %v995_v52 }
 0x76f   : > { %v1141_v55 = vpop.f32.mrf.mxu0 }
 0x770   : > { %v1142_v56 = vadd.f32 %v1141_v55, %v1096_v54 }
 0x771   : > { %v1143_v49 = vpop.f32.mrf.mxu0 }
 0x772   : > { %v1148_v57 = vmax.f32 %v1142_v56, 0.0  ;;  %v1144_v53 = vadd.f32 %v1143_v49, %v1097_v50 }
 0x773   : > { %v1145_v58 = vpop.f32.mrf.mxu0 }
 0x774   : > { %1150 = vst [vmem:[%s1697_s20] sm:$0xff] %v1148_v57  ;;  %v1149_v59 = vmax.f32 %v1144_v53, 0.0 }
 0x775   : > { %v1146_v60 = vpop.f32.mrf.mxu0 }
 0x776   : > { %1151 = vst [vmem:[%s1697_s20 + $0x8] sm:$0xff] %v1149_v59 }
 0x777 PF: > { %s2168_s19 = sld [smem:[#allocation6_spill]] }
 0x778   : > { %s2169_s21 = sld [smem:[#allocation4_spill]] }
 0x779   : > { %s2170_s22 = sld [smem:[#allocation5_spill]] }
 0x77a   : > { %s2171_s23 = sld [smem:[#allocation7_spill]] }
 0x77b   : > { %s2172_s24 = sld [smem:[#allocation8_spill]] }
 0x77d   : > { %s23_s25 = sadd.s32 1, %s2168_s19  }
 0x77e   : > { %p20_p9 = scmp.ge.s32.totalorder %s23_s25, 8  }
 0x780   :  { %22 = sbr.rel (!%p20_p9) target bundleno = 3 (0x3), region = 117 }

</bundles_post_ra>
